<compile_context>
chip_gen: v6e
topology: v6e:2x2x1
jax: 0.10.0
libtpu: 0.0.40
codegen_flags: <defaults>
</compile_context>

<pallas_src>
import math

import jax
import jax.numpy as jnp
from jax.experimental import pallas as pl
from jax.experimental.pallas import tpu as pltpu

EPS = 1e-5


def _round_up(v, m):
    return pl.cdiv(v, m) * m


def _pick_tp(P):
    """Pixel-tile size.

    - tiles as large as possible (target <= ~1024 rows) to amortize the
      ~0.35us per-grid-step overhead and keep DMA/MXU cadence high,
    - even number of tiles so the single "parallel" axis load-balances across
      v7x's two TensorCores (harmless on single-TC v5e/v6e),
    - tile rows a multiple of 128 so every BlockSpec (including the
      (n_pad, tp) pool-selector block) stays lane/sublane aligned.
    """
    ntiles = max(2, 2 * pl.cdiv(pl.cdiv(P, 1024), 2))
    return _round_up(pl.cdiv(P, ntiles), 128)


def _make_kernel(cp):
    def gao_kernel(p_ref, sel_ref, w1, b1, w2, b2, wx, b3, w4, b4,
                   wd1, b5, w6, b6, wd2, b7, o_ref):
        bf16 = jnp.bfloat16

        def mm(x, w):
            # bf16 operands on the MXU, f32 accumulation.
            return jnp.dot(x.astype(bf16), w[...],
                           preferred_element_type=jnp.float32)

        def relu(y, b):
            return jnp.maximum(y + b[...], 0.0)

        x = relu(mm(p_ref[...], w1), b1)            # conv1 + bn1 + relu -> 32
        x = relu(mm(x, w2), b2)                     # conv2 + bn2 + relu -> 64
        xb = x.astype(bf16)

        # Single MXU pass for everything that consumes x: [w7x | w3 | w5a]
        tx = mm(xb, wx)                             # (tp, cp + 128)
        d1 = relu(tx[:, cp:cp + 64], b3)            # conv3 + bn3 + relu -> 64
        d1 = relu(mm(d1, w4), b4)                   # conv4 + bn4 + relu -> 64
        d1b = d1.astype(bf16)

        # Single pass for everything that consumes d1: [w7d1 | w5b]
        td1 = mm(d1b, wd1)                          # (tp, cp + 64)
        # conv5 over cat(x, d1) as split matmul (concat never materialized)
        d2 = relu(tx[:, cp + 64:cp + 128] + td1[:, cp:cp + 64], b5)
        d2 = relu(mm(d2, w6), b6)                   # conv6 + bn6 + relu -> 64
        d2b = d2.astype(bf16)

        # final_conv7 over cat(x, x, d1, d2); duplicated x pre-summed in glue.
        feat = relu(tx[:, :cp] + td1[:, :cp] + mm(d2b, wd2), b7)

        # Fused pool head: per-image masked column sums for this pixel tile.
        # sel is a one-hot image selector with the 2x2-crop / pixel-padding /
        # image-padding mask folded in, so invalid rows contribute exactly 0.
        o_ref[...] = jnp.dot(sel_ref[...], feat.astype(bf16),
                             preferred_element_type=jnp.float32)

    return gao_kernel


def init_params(key, input_channels, n_classes):
    """Deterministic init mirroring the module's __init__ (BN folded in, eval)."""
    specs = [  # (cout, cin, k)
        (32, input_channels, 3),   # conv1
        (64, 32, 1),               # conv2
        (64, 64, 1),               # conv3
        (64, 64, 1),               # conv4
        (64, 128, 1),              # conv5
        (64, 64, 1),               # conv6
        (n_classes, 256, 1),       # final_conv7
    ]
    bn_scale = 1.0 / math.sqrt(1.0 + EPS)  # gamma=1, beta=0, mean=0, var=1
    params = []
    for (cout, cin, k) in specs:
        key, kw, kb = jax.random.split(key, 3)
        std = math.sqrt(2.0 / (k * k * cout))
        w = jax.random.normal(kw, (cout, cin, k, k), jnp.float32) * std
        bound = 1.0 / math.sqrt(cin * k * k)
        b = jax.random.uniform(kb, (cout,), jnp.float32, -bound, bound)
        if k == 3:
            # matches im2col feature order (kh, kw, cin)
            w_mat = jnp.transpose(w, (2, 3, 1, 0)).reshape(k * k * cin, cout)
        else:
            w_mat = w.reshape(cout, cin).T
        params.append((w_mat * bn_scale, (b * bn_scale).reshape(1, cout)))
    return params


def prep_kernel_params(params, n_classes):
    """Pad / split / N-concatenate the per-layer matrices into kernel operands."""
    (w1, b1), (w2, b2), (w3, b3), (w4, b4), (w5, b5), (w6, b6), (w7, b7) = params

    # conv7 output lanes padded to a multiple of 128 (lane-dense MXU output).
    cp = _round_up(n_classes, 128)
    w7p = jnp.pad(w7, ((0, 0), (0, cp - n_classes)))
    b7p = jnp.pad(b7, ((0, 0), (0, cp - n_classes)))

    # cat2 = [x, x, d1, d2]: pre-sum the two duplicated x slices.
    w7x = w7p[0:64] + w7p[64:128]
    w7d1, w7d2 = w7p[128:192], w7p[192:256]
    # cat1 = [x, d1]: split conv5 into its two 64-wide members.
    w5a, w5b = w5[:64], w5[64:]

    # N-concatenate weights that share the same LHS (128-wide block first so
    # the lane splits land on vreg boundaries).
    wx = jnp.concatenate([w7x, w3, w5a], axis=1)    # (64, cp + 128)
    wd1 = jnp.concatenate([w7d1, w5b], axis=1)      # (64, cp + 64)

    bf = lambda a: a.astype(jnp.bfloat16)
    weights = [bf(w1), b1, bf(w2), b2, bf(wx), b3, bf(w4), b4,
               bf(wd1), b5, bf(w6), b6, bf(w7d2), b7p]
    return weights, cp


def _im2col(x_nchw):
    N, Cin, H, W = x_nchw.shape
    Ho, Wo = H - 2, W - 2
    x_nhwc = jnp.transpose(x_nchw, (0, 2, 3, 1))
    patches = jnp.stack(
        [x_nhwc[:, kh:kh + Ho, kw:kw + Wo, :] for kh in range(3) for kw in range(3)],
        axis=3)                                    # (N, Ho, Wo, 9, Cin)
    return patches.reshape(N * Ho * Wo, 9 * Cin).astype(jnp.float32), Ho, Wo


def _pool_selector(N, Ho, Wo, n_rows):
    """One-hot image selector (n_rows, N*Ho*Wo) with the 2x2-crop mask folded in."""
    Hc, Wc = (Ho // 2) * 2, (Wo // 2) * 2
    crop2d = (jnp.arange(Ho)[:, None] < Hc) & (jnp.arange(Wo)[None, :] < Wc)
    crop = jnp.tile(crop2d.reshape(-1).astype(jnp.float32), N)        # (P,)
    img = jnp.repeat(jnp.arange(N), Ho * Wo)                          # (P,)
    onehot = (img[None, :] == jnp.arange(n_rows)[:, None]).astype(jnp.float32)
    return onehot * crop[None, :], Hc * Wc


def _pool_head(feat_flat, N, Ho, Wo, n_classes):
    """Explicit AvgPool2d((2,2),2) + AdaptiveAvgPool2d(1) (f32 reference only)."""
    feat = feat_flat.reshape(N, Ho, Wo, n_classes)
    Hc, Wc = (Ho // 2) * 2, (Wo // 2) * 2
    pooled = feat[:, :Hc, :Wc, :].reshape(N, Hc // 2, 2, Wc // 2, 2,
                                          n_classes).mean(axis=(2, 4))
    return pooled.mean(axis=(1, 2))


def gao_forward(x_nchw, params, n_classes):
    N = x_nchw.shape[0]
    patches, Ho, Wo = _im2col(x_nchw)
    P, K1 = patches.shape

    weights, cp = prep_kernel_params(params, n_classes)

    tp = _pick_tp(P)
    p_pad = _round_up(P, tp)
    grid = p_pad // tp
    n_pad = _round_up(N, 8)

    # bf16 patches in HBM, true feature width (no 128-lane padding).
    patches = jnp.pad(patches, ((0, p_pad - P), (0, 0))).astype(jnp.bfloat16)

    # Pool selector, pre-transposed to (n_pad, p_pad) so the kernel reduction
    # is a plain (n_pad, tp) @ (tp, cp) matmul; padded pixels/images are zero.
    sel, crop_count = _pool_selector(N, Ho, Wo, n_pad)
    sel = jnp.pad(sel, ((0, 0), (0, p_pad - P))).astype(jnp.bfloat16)

    in_specs = [pl.BlockSpec((tp, K1), lambda i: (i, 0)),
                pl.BlockSpec((n_pad, tp), lambda i: (0, i))]
    # Grid-invariant weights/biases: constant block index -> Mosaic does not
    # re-DMA them between grid steps.
    in_specs += [pl.BlockSpec(w.shape, lambda i: (0, 0)) for w in weights]

    partial = pl.pallas_call(
        _make_kernel(cp),
        out_shape=jax.ShapeDtypeStruct((grid, n_pad, cp), jnp.float32),
        grid_spec=pltpu.PrefetchScalarGridSpec(
            num_scalar_prefetch=0,
            grid=(grid,),
            in_specs=in_specs,
            out_specs=pl.BlockSpec((None, n_pad, cp), lambda i: (i, 0, 0)),
        ),
        compiler_params=pltpu.CompilerParams(
            dimension_semantics=("parallel",),
            vmem_limit_bytes=32 * 1024 * 1024),
    )(patches, sel, *weights)

    sums = partial.sum(axis=0)[:N, :n_classes]
    return sums / float(crop_count)


def reference_forward_f32(x_nchw, params, n_classes):
    """Module-faithful plain-f32 reference (explicit concats, explicit pooling)."""
    N = x_nchw.shape[0]
    patches, Ho, Wo = _im2col(x_nchw)

    def layer(x, w, b):
        return jnp.maximum(x @ w + b, 0.0)

    (w1, b1), (w2, b2), (w3, b3), (w4, b4), (w5, b5), (w6, b6), (w7, b7) = params
    x = layer(patches, w1, b1)
    x = layer(x, w2, b2)
    d1 = layer(layer(x, w3, b3), w4, b4)
    cat1 = jnp.concatenate([x, d1], axis=-1)
    d2 = layer(layer(cat1, w5, b5), w6, b6)
    cat2 = jnp.concatenate([x, cat1, d2], axis=-1)
    feat = layer(cat2, w7, b7)
    return _pool_head(feat, N, Ho, Wo, n_classes)


def reference_forward_kernel_math(x_nchw, params, n_classes):
    """Mirrors the kernel's exact math (bf16 operands, concatenated weights,
    fused bf16 pool-selector reduction)."""
    N = x_nchw.shape[0]
    patches, Ho, Wo = _im2col(x_nchw)
    weights, cp = prep_kernel_params(params, n_classes)
    (w1, b1, w2, b2, wx, b3, w4, b4, wd1, b5, w6, b6, wd2, b7) = weights
    pb = patches.astype(jnp.bfloat16)

    def mm(x, w):
        return jnp.dot(x.astype(jnp.bfloat16), w, preferred_element_type=jnp.float32)

    def relu(y, b):
        return jnp.maximum(y + b, 0.0)

    x = relu(mm(pb, w1), b1)
    x = relu(mm(x, w2), b2)
    tx = mm(x, wx)
    d1 = relu(tx[:, cp:cp + 64], b3)
    d1 = relu(mm(d1, w4), b4)
    td1 = mm(d1, wd1)
    d2 = relu(tx[:, cp + 64:cp + 128] + td1[:, cp:cp + 64], b5)
    d2 = relu(mm(d2, w6), b6)
    feat = relu(tx[:, :cp] + td1[:, :cp] + mm(d2, wd2), b7)

    sel, crop_count = _pool_selector(N, Ho, Wo, N)
    sums = jnp.dot(sel.astype(jnp.bfloat16),
                   feat[:, :n_classes].astype(jnp.bfloat16),
                   preferred_element_type=jnp.float32)
    return sums / float(crop_count)


if __name__ == "__main__":
    key = jax.random.PRNGKey(0)
    kx, kp = jax.random.split(key)

    N, Cin, H, W = 2, 4, 16, 16
    n_classes = 10

    x = jax.random.normal(kx, (N, Cin, H, W), dtype=jnp.float32)
    params = init_params(kp, Cin, n_classes)

    out = gao_forward(x, params, n_classes)
    out = jax.block_until_ready(out)

    ref_k = reference_forward_kernel_math(x, params, n_classes)
    ref_f = reference_forward_f32(x, params, n_classes)

    assert out.shape == (N, n_classes), out.shape
    # Tight check vs a reference that mirrors the kernel's math exactly.
    assert jnp.allclose(out, ref_k, atol=2e-3, rtol=2e-3), "mismatch vs kernel-math ref"
    # Loose check vs the module-faithful f32 reference (bf16 rounding only).
    assert jnp.allclose(out, ref_f, atol=1e-1, rtol=1e-1), "mismatch vs f32 reference"

    print("KERNEL_OK")
</pallas_src>

<mosaic_0001>
module attributes {stable_mosaic.version = 11 : i64} {
  func.func @gao_kernel(%arg0: i32, %arg1: memref<256x36xbf16, #tpu.memory_space<vmem>>, %arg2: memref<8x256xbf16, #tpu.memory_space<vmem>>, %arg3: memref<36x32xbf16, #tpu.memory_space<vmem>>, %arg4: memref<1x32xf32, #tpu.memory_space<vmem>>, %arg5: memref<32x64xbf16, #tpu.memory_space<vmem>>, %arg6: memref<1x64xf32, #tpu.memory_space<vmem>>, %arg7: memref<64x256xbf16, #tpu.memory_space<vmem>>, %arg8: memref<1x64xf32, #tpu.memory_space<vmem>>, %arg9: memref<64x64xbf16, #tpu.memory_space<vmem>>, %arg10: memref<1x64xf32, #tpu.memory_space<vmem>>, %arg11: memref<64x192xbf16, #tpu.memory_space<vmem>>, %arg12: memref<1x64xf32, #tpu.memory_space<vmem>>, %arg13: memref<64x64xbf16, #tpu.memory_space<vmem>>, %arg14: memref<1x64xf32, #tpu.memory_space<vmem>>, %arg15: memref<64x128xbf16, #tpu.memory_space<vmem>>, %arg16: memref<1x128xf32, #tpu.memory_space<vmem>>, %arg17: memref<1x8x128xf32, #tpu.memory_space<vmem>>) attributes {dimension_semantics = [#tpu.dimension_semantics<parallel>], iteration_bounds = array<i64: 2>, scalar_prefetch = 0 : i64, scratch_operands = 0 : i64, tpu.core_type = #tpu.core_type<tc>, window_params = [{transform_indices = @transform_0, window_bounds = array<i64: 256, 36>}, {transform_indices = @transform_1, window_bounds = array<i64: 8, 256>}, {pipeline_mode = #tpu.pipeline_mode<synchronous>, transform_indices = @transform_2, window_bounds = array<i64: 36, 32>}, {pipeline_mode = #tpu.pipeline_mode<synchronous>, transform_indices = @transform_3, window_bounds = array<i64: 1, 32>}, {pipeline_mode = #tpu.pipeline_mode<synchronous>, transform_indices = @transform_4, window_bounds = array<i64: 32, 64>}, {pipeline_mode = #tpu.pipeline_mode<synchronous>, transform_indices = @transform_5, window_bounds = array<i64: 1, 64>}, {pipeline_mode = #tpu.pipeline_mode<synchronous>, transform_indices = @transform_6, window_bounds = array<i64: 64, 256>}, {pipeline_mode = #tpu.pipeline_mode<synchronous>, transform_indices = @transform_7, window_bounds = array<i64: 1, 64>}, {pipeline_mode = #tpu.pipeline_mode<synchronous>, transform_indices = @transform_8, window_bounds = array<i64: 64, 64>}, {pipeline_mode = #tpu.pipeline_mode<synchronous>, transform_indices = @transform_9, window_bounds = array<i64: 1, 64>}, {pipeline_mode = #tpu.pipeline_mode<synchronous>, transform_indices = @transform_10, window_bounds = array<i64: 64, 192>}, {pipeline_mode = #tpu.pipeline_mode<synchronous>, transform_indices = @transform_11, window_bounds = array<i64: 1, 64>}, {pipeline_mode = #tpu.pipeline_mode<synchronous>, transform_indices = @transform_12, window_bounds = array<i64: 64, 64>}, {pipeline_mode = #tpu.pipeline_mode<synchronous>, transform_indices = @transform_13, window_bounds = array<i64: 1, 64>}, {pipeline_mode = #tpu.pipeline_mode<synchronous>, transform_indices = @transform_14, window_bounds = array<i64: 64, 128>}, {pipeline_mode = #tpu.pipeline_mode<synchronous>, transform_indices = @transform_15, window_bounds = array<i64: 1, 128>}, {transform_indices = @transform_16, window_bounds = array<i64: 1, 8, 128>}]} {
    %c0 = arith.constant 0 : index
    %c0_0 = arith.constant 0 : index
    %0 = vector.load %arg1[%c0, %c0_0] : memref<256x36xbf16, #tpu.memory_space<vmem>>, vector<256x36xbf16>
    %c0_1 = arith.constant 0 : index
    %c0_2 = arith.constant 0 : index
    %1 = vector.load %arg3[%c0_1, %c0_2] : memref<36x32xbf16, #tpu.memory_space<vmem>>, vector<36x32xbf16>
    %cst = arith.constant dense<0.000000e+00> : vector<256x32xf32>
    %2 = tpu.matmul %0, %1, %cst {dimension_numbers = #tpu.dot_dimension_numbers<[1], [0], [0], [1], [0, 0, 1, 1], [], []>} : vector<256x36xbf16>, vector<36x32xbf16>, vector<256x32xf32> -> vector<256x32xf32>
    %c0_3 = arith.constant 0 : index
    %c0_4 = arith.constant 0 : index
    %3 = vector.load %arg4[%c0_3, %c0_4] : memref<1x32xf32, #tpu.memory_space<vmem>>, vector<1x32xf32>
    %4 = vector.broadcast %3 : vector<1x32xf32> to vector<256x32xf32>
    %5 = arith.addf %2, %4 : vector<256x32xf32>
    %cst_5 = arith.constant 0.000000e+00 : f32
    %6 = vector.broadcast %cst_5 : f32 to vector<256x32xf32>
    %7 = arith.maximumf %5, %6 : vector<256x32xf32>
    %8 = arith.truncf %7 : vector<256x32xf32> to vector<256x32xbf16>
    %c0_6 = arith.constant 0 : index
    %c0_7 = arith.constant 0 : index
    %9 = vector.load %arg5[%c0_6, %c0_7] : memref<32x64xbf16, #tpu.memory_space<vmem>>, vector<32x64xbf16>
    %cst_8 = arith.constant dense<0.000000e+00> : vector<256x64xf32>
    %10 = tpu.matmul %8, %9, %cst_8 {dimension_numbers = #tpu.dot_dimension_numbers<[1], [0], [0], [1], [0, 0, 1, 1], [], []>} : vector<256x32xbf16>, vector<32x64xbf16>, vector<256x64xf32> -> vector<256x64xf32>
    %c0_9 = arith.constant 0 : index
    %c0_10 = arith.constant 0 : index
    %11 = vector.load %arg6[%c0_9, %c0_10] : memref<1x64xf32, #tpu.memory_space<vmem>>, vector<1x64xf32>
    %12 = vector.broadcast %11 : vector<1x64xf32> to vector<256x64xf32>
    %13 = arith.addf %10, %12 : vector<256x64xf32>
    %cst_11 = arith.constant 0.000000e+00 : f32
    %14 = vector.broadcast %cst_11 : f32 to vector<256x64xf32>
    %15 = arith.maximumf %13, %14 : vector<256x64xf32>
    %16 = arith.truncf %15 : vector<256x64xf32> to vector<256x64xbf16>
    %c0_12 = arith.constant 0 : index
    %c0_13 = arith.constant 0 : index
    %17 = vector.load %arg7[%c0_12, %c0_13] : memref<64x256xbf16, #tpu.memory_space<vmem>>, vector<64x256xbf16>
    %cst_14 = arith.constant dense<0.000000e+00> : vector<256x256xf32>
    %18 = tpu.matmul %16, %17, %cst_14 {dimension_numbers = #tpu.dot_dimension_numbers<[1], [0], [0], [1], [0, 0, 1, 1], [], []>} : vector<256x64xbf16>, vector<64x256xbf16>, vector<256x256xf32> -> vector<256x256xf32>
    %19 = vector.extract_strided_slice %18 {offsets = [0, 128], sizes = [256, 64], strides = [1, 1]} : vector<256x256xf32> to vector<256x64xf32>
    %c0_15 = arith.constant 0 : index
    %c0_16 = arith.constant 0 : index
    %20 = vector.load %arg8[%c0_15, %c0_16] : memref<1x64xf32, #tpu.memory_space<vmem>>, vector<1x64xf32>
    %21 = vector.broadcast %20 : vector<1x64xf32> to vector<256x64xf32>
    %22 = arith.addf %19, %21 : vector<256x64xf32>
    %cst_17 = arith.constant 0.000000e+00 : f32
    %23 = vector.broadcast %cst_17 : f32 to vector<256x64xf32>
    %24 = arith.maximumf %22, %23 : vector<256x64xf32>
    %25 = arith.truncf %24 : vector<256x64xf32> to vector<256x64xbf16>
    %c0_18 = arith.constant 0 : index
    %c0_19 = arith.constant 0 : index
    %26 = vector.load %arg9[%c0_18, %c0_19] : memref<64x64xbf16, #tpu.memory_space<vmem>>, vector<64x64xbf16>
    %cst_20 = arith.constant dense<0.000000e+00> : vector<256x64xf32>
    %27 = tpu.matmul %25, %26, %cst_20 {dimension_numbers = #tpu.dot_dimension_numbers<[1], [0], [0], [1], [0, 0, 1, 1], [], []>} : vector<256x64xbf16>, vector<64x64xbf16>, vector<256x64xf32> -> vector<256x64xf32>
    %c0_21 = arith.constant 0 : index
    %c0_22 = arith.constant 0 : index
    %28 = vector.load %arg10[%c0_21, %c0_22] : memref<1x64xf32, #tpu.memory_space<vmem>>, vector<1x64xf32>
    %29 = vector.broadcast %28 : vector<1x64xf32> to vector<256x64xf32>
    %30 = arith.addf %27, %29 : vector<256x64xf32>
    %cst_23 = arith.constant 0.000000e+00 : f32
    %31 = vector.broadcast %cst_23 : f32 to vector<256x64xf32>
    %32 = arith.maximumf %30, %31 : vector<256x64xf32>
    %33 = arith.truncf %32 : vector<256x64xf32> to vector<256x64xbf16>
    %c0_24 = arith.constant 0 : index
    %c0_25 = arith.constant 0 : index
    %34 = vector.load %arg11[%c0_24, %c0_25] : memref<64x192xbf16, #tpu.memory_space<vmem>>, vector<64x192xbf16>
    %cst_26 = arith.constant dense<0.000000e+00> : vector<256x192xf32>
    %35 = tpu.matmul %33, %34, %cst_26 {dimension_numbers = #tpu.dot_dimension_numbers<[1], [0], [0], [1], [0, 0, 1, 1], [], []>} : vector<256x64xbf16>, vector<64x192xbf16>, vector<256x192xf32> -> vector<256x192xf32>
    %36 = vector.extract_strided_slice %18 {offsets = [0, 192], sizes = [256, 64], strides = [1, 1]} : vector<256x256xf32> to vector<256x64xf32>
    %37 = vector.extract_strided_slice %35 {offsets = [0, 128], sizes = [256, 64], strides = [1, 1]} : vector<256x192xf32> to vector<256x64xf32>
    %38 = arith.addf %36, %37 : vector<256x64xf32>
    %c0_27 = arith.constant 0 : index
    %c0_28 = arith.constant 0 : index
    %39 = vector.load %arg12[%c0_27, %c0_28] : memref<1x64xf32, #tpu.memory_space<vmem>>, vector<1x64xf32>
    %40 = vector.broadcast %39 : vector<1x64xf32> to vector<256x64xf32>
    %41 = arith.addf %38, %40 : vector<256x64xf32>
    %cst_29 = arith.constant 0.000000e+00 : f32
    %42 = vector.broadcast %cst_29 : f32 to vector<256x64xf32>
    %43 = arith.maximumf %41, %42 : vector<256x64xf32>
    %44 = arith.truncf %43 : vector<256x64xf32> to vector<256x64xbf16>
    %c0_30 = arith.constant 0 : index
    %c0_31 = arith.constant 0 : index
    %45 = vector.load %arg13[%c0_30, %c0_31] : memref<64x64xbf16, #tpu.memory_space<vmem>>, vector<64x64xbf16>
    %cst_32 = arith.constant dense<0.000000e+00> : vector<256x64xf32>
    %46 = tpu.matmul %44, %45, %cst_32 {dimension_numbers = #tpu.dot_dimension_numbers<[1], [0], [0], [1], [0, 0, 1, 1], [], []>} : vector<256x64xbf16>, vector<64x64xbf16>, vector<256x64xf32> -> vector<256x64xf32>
    %c0_33 = arith.constant 0 : index
    %c0_34 = arith.constant 0 : index
    %47 = vector.load %arg14[%c0_33, %c0_34] : memref<1x64xf32, #tpu.memory_space<vmem>>, vector<1x64xf32>
    %48 = vector.broadcast %47 : vector<1x64xf32> to vector<256x64xf32>
    %49 = arith.addf %46, %48 : vector<256x64xf32>
    %cst_35 = arith.constant 0.000000e+00 : f32
    %50 = vector.broadcast %cst_35 : f32 to vector<256x64xf32>
    %51 = arith.maximumf %49, %50 : vector<256x64xf32>
    %52 = arith.truncf %51 : vector<256x64xf32> to vector<256x64xbf16>
    %53 = vector.extract_strided_slice %18 {offsets = [0, 0], sizes = [256, 128], strides = [1, 1]} : vector<256x256xf32> to vector<256x128xf32>
    %54 = vector.extract_strided_slice %35 {offsets = [0, 0], sizes = [256, 128], strides = [1, 1]} : vector<256x192xf32> to vector<256x128xf32>
    %55 = arith.addf %53, %54 : vector<256x128xf32>
    %c0_36 = arith.constant 0 : index
    %c0_37 = arith.constant 0 : index
    %56 = vector.load %arg15[%c0_36, %c0_37] : memref<64x128xbf16, #tpu.memory_space<vmem>>, vector<64x128xbf16>
    %cst_38 = arith.constant dense<0.000000e+00> : vector<256x128xf32>
    %57 = tpu.matmul %52, %56, %cst_38 {dimension_numbers = #tpu.dot_dimension_numbers<[1], [0], [0], [1], [0, 0, 1, 1], [], []>} : vector<256x64xbf16>, vector<64x128xbf16>, vector<256x128xf32> -> vector<256x128xf32>
    %58 = arith.addf %55, %57 : vector<256x128xf32>
    %c0_39 = arith.constant 0 : index
    %c0_40 = arith.constant 0 : index
    %59 = vector.load %arg16[%c0_39, %c0_40] : memref<1x128xf32, #tpu.memory_space<vmem>>, vector<1x128xf32>
    %60 = vector.broadcast %59 : vector<1x128xf32> to vector<256x128xf32>
    %61 = arith.addf %58, %60 : vector<256x128xf32>
    %cst_41 = arith.constant 0.000000e+00 : f32
    %62 = vector.broadcast %cst_41 : f32 to vector<256x128xf32>
    %63 = arith.maximumf %61, %62 : vector<256x128xf32>
    %c0_42 = arith.constant 0 : index
    %c0_43 = arith.constant 0 : index
    %64 = vector.load %arg2[%c0_42, %c0_43] : memref<8x256xbf16, #tpu.memory_space<vmem>>, vector<8x256xbf16>
    %65 = arith.truncf %63 : vector<256x128xf32> to vector<256x128xbf16>
    %cst_44 = arith.constant dense<0.000000e+00> : vector<8x128xf32>
    %66 = tpu.matmul %64, %65, %cst_44 {dimension_numbers = #tpu.dot_dimension_numbers<[1], [0], [0], [1], [0, 0, 1, 1], [], []>} : vector<8x256xbf16>, vector<256x128xbf16>, vector<8x128xf32> -> vector<8x128xf32>
    %c0_45 = arith.constant 0 : index
    %c0_46 = arith.constant 0 : index
    %c0_47 = arith.constant 0 : index
    %67 = vector.load %arg17[%c0_45, %c0_46, %c0_47] : memref<1x8x128xf32, #tpu.memory_space<vmem>>, vector<1x8x128xf32>
    %68 = vector.shape_cast %67 : vector<1x8x128xf32> to vector<8x128xf32>
    %69 = vector.shape_cast %66 : vector<8x128xf32> to vector<1x8x128xf32>
    tpu.vector_store %arg17[%c0_45, %c0_46, %c0_47], %69 {strides = array<i32>} : memref<1x8x128xf32, #tpu.memory_space<vmem>>, vector<1x8x128xf32>,
    return
  }
  func.func @transform_0(%arg0: i32) -> (i32, i32) {
    %c0_i32 = arith.constant 0 : i32
    %c0_i32_0 = arith.constant 0 : i32
    return %arg0, %c0_i32 : i32, i32
  }
  func.func @transform_1(%arg0: i32) -> (i32, i32) {
    %c0_i32 = arith.constant 0 : i32
    %c0_i32_0 = arith.constant 0 : i32
    return %c0_i32, %arg0 : i32, i32
  }
  func.func @transform_2(%arg0: i32) -> (i32, i32) {
    %c0_i32 = arith.constant 0 : i32
    %c0_i32_0 = arith.constant 0 : i32
    %c0_i32_1 = arith.constant 0 : i32
    return %c0_i32, %c0_i32_0 : i32, i32
  }
  func.func @transform_3(%arg0: i32) -> (i32, i32) {
    %c0_i32 = arith.constant 0 : i32
    %c0_i32_0 = arith.constant 0 : i32
    %c0_i32_1 = arith.constant 0 : i32
    return %c0_i32, %c0_i32_0 : i32, i32
  }
  func.func @transform_4(%arg0: i32) -> (i32, i32) {
    %c0_i32 = arith.constant 0 : i32
    %c0_i32_0 = arith.constant 0 : i32
    %c0_i32_1 = arith.constant 0 : i32
    return %c0_i32, %c0_i32_0 : i32, i32
  }
  func.func @transform_5(%arg0: i32) -> (i32, i32) {
    %c0_i32 = arith.constant 0 : i32
    %c0_i32_0 = arith.constant 0 : i32
    %c0_i32_1 = arith.constant 0 : i32
    return %c0_i32, %c0_i32_0 : i32, i32
  }
  func.func @transform_6(%arg0: i32) -> (i32, i32) {
    %c0_i32 = arith.constant 0 : i32
    %c0_i32_0 = arith.constant 0 : i32
    %c0_i32_1 = arith.constant 0 : i32
    return %c0_i32, %c0_i32_0 : i32, i32
  }
  func.func @transform_7(%arg0: i32) -> (i32, i32) {
    %c0_i32 = arith.constant 0 : i32
    %c0_i32_0 = arith.constant 0 : i32
    %c0_i32_1 = arith.constant 0 : i32
    return %c0_i32, %c0_i32_0 : i32, i32
  }
  func.func @transform_8(%arg0: i32) -> (i32, i32) {
    %c0_i32 = arith.constant 0 : i32
    %c0_i32_0 = arith.constant 0 : i32
    %c0_i32_1 = arith.constant 0 : i32
    return %c0_i32, %c0_i32_0 : i32, i32
  }
  func.func @transform_9(%arg0: i32) -> (i32, i32) {
    %c0_i32 = arith.constant 0 : i32
    %c0_i32_0 = arith.constant 0 : i32
    %c0_i32_1 = arith.constant 0 : i32
    return %c0_i32, %c0_i32_0 : i32, i32
  }
  func.func @transform_10(%arg0: i32) -> (i32, i32) {
    %c0_i32 = arith.constant 0 : i32
    %c0_i32_0 = arith.constant 0 : i32
    %c0_i32_1 = arith.constant 0 : i32
    return %c0_i32, %c0_i32_0 : i32, i32
  }
  func.func @transform_11(%arg0: i32) -> (i32, i32) {
    %c0_i32 = arith.constant 0 : i32
    %c0_i32_0 = arith.constant 0 : i32
    %c0_i32_1 = arith.constant 0 : i32
    return %c0_i32, %c0_i32_0 : i32, i32
  }
  func.func @transform_12(%arg0: i32) -> (i32, i32) {
    %c0_i32 = arith.constant 0 : i32
    %c0_i32_0 = arith.constant 0 : i32
    %c0_i32_1 = arith.constant 0 : i32
    return %c0_i32, %c0_i32_0 : i32, i32
  }
  func.func @transform_13(%arg0: i32) -> (i32, i32) {
    %c0_i32 = arith.constant 0 : i32
    %c0_i32_0 = arith.constant 0 : i32
    %c0_i32_1 = arith.constant 0 : i32
    return %c0_i32, %c0_i32_0 : i32, i32
  }
  func.func @transform_14(%arg0: i32) -> (i32, i32) {
    %c0_i32 = arith.constant 0 : i32
    %c0_i32_0 = arith.constant 0 : i32
    %c0_i32_1 = arith.constant 0 : i32
    return %c0_i32, %c0_i32_0 : i32, i32
  }
  func.func @transform_15(%arg0: i32) -> (i32, i32) {
    %c0_i32 = arith.constant 0 : i32
    %c0_i32_0 = arith.constant 0 : i32
    %c0_i32_1 = arith.constant 0 : i32
    return %c0_i32, %c0_i32_0 : i32, i32
  }
  func.func @transform_16(%arg0: i32) -> (i32, i32, i32) {
    %c0_i32 = arith.constant 0 : i32
    %c0_i32_0 = arith.constant 0 : i32
    %c0_i32_1 = arith.constant 0 : i32
    return %arg0, %c0_i32, %c0_i32_0 : i32, i32, i32
  }
}

</mosaic_0001>

<bundles_post_ra>
// kernel: tpu_custom_call.1
= control target key start
LH: loop header
LB: loop body
LE: loop exit
PB: predicated region body
PF: predicated region fallthrough
CT: control target
= control target key end

     0   :  { %s5086_s0 = inlined_call_operand.vmem [shape: bf16[512,36], index: 0, kind: input, shape index: {}]   ;;  %s5087_s1 = inlined_call_operand.vmem [shape: bf16[8,512], index: 1, kind: input, shape index: {}]   ;;  %s5088_s2 = inlined_call_operand.vmem [shape: bf16[36,32], index: 2, kind: input, shape index: {}]   ;;  %s5089_s3 = inlined_call_operand.vmem [shape: f32[1,32], index: 3, kind: input, shape index: {}]   ;;  %s5090_s4 = inlined_call_operand.vmem [shape: bf16[32,64], index: 4, kind: input, shape index: {}]   ;;  %s5091_s5 = inlined_call_operand.vmem [shape: f32[1,64], index: 5, kind: input, shape index: {}]   ;;  %s5092_s6 = inlined_call_operand.vmem [shape: bf16[64,256], index: 6, kind: input, shape index: {}]   ;;  %s5093_s7 = inlined_call_operand.vmem [shape: f32[1,64], index: 7, kind: input, shape index: {}]   ;;  %s5094_s8 = inlined_call_operand.vmem [shape: bf16[64,64], index: 8, kind: input, shape index: {}]   ;;  %s5095_s9 = inlined_call_operand.vmem [shape: f32[1,64], index: 9, kind: input, shape index: {}]   ;;  %s5096_s10 = inlined_call_operand.vmem [shape: bf16[64,192], index: 10, kind: input, shape index: {}]   ;;  %s5097_s11 = inlined_call_operand.vmem [shape: f32[1,64], index: 11, kind: input, shape index: {}]   ;;  %s5098_s12 = inlined_call_operand.vmem [shape: bf16[64,64], index: 12, kind: input, shape index: {}]   ;;  %s5099_s13 = inlined_call_operand.vmem [shape: f32[1,64], index: 13, kind: input, shape index: {}]   ;;  %s5100_s14 = inlined_call_operand.vmem [shape: bf16[64,128], index: 14, kind: input, shape index: {}]   ;;  %s5101_s15 = inlined_call_operand.vmem [shape: f32[1,128], index: 15, kind: input, shape index: {}]   ;;  %s5102_s16 = inlined_call_operand.hbm [shape: f32[2,8,128], index: 16, kind: output, shape index: {}]  }
   0x1   :  { %5108 = sst [smem:[#allocation55_spill]] %s5086_s0 }
   0x2   :  { %5109 = sst [smem:[#allocation56_spill]] %s5087_s1 }
   0x3   :  { %5110 = sst [smem:[#allocation57_spill]] %s5088_s2 }
   0x4   :  { %21 = vsyncpa [#allocation3], 0 }
   0x5   :  { %23 = vsyncpa [#allocation3 + $0x1], 0  ;;  %s4059_s21 = smov 0   ;;  %s4061_s22 = smov 0  }
   0x6   :  { %s4063_s23 = smov 0   ;;  %s4065_s24 = smov 0  }
   0x7 LB: > { %5111 = sst [smem:[#allocation5_spill]] %s3965_s23  ;;  %s4080_s25 = sadd.s32 4294967295, %s3969_s24   ;;  %s3969_s24 = sphi %s4065_s24, %s5214_s24   ;;  %s3965_s23 = sphi %s4063_s23, %s5216_s23   ;;  %s3961_s22 = sphi %s4061_s22, %s5218_s22   ;;  %s3957_s21 = sphi %s4059_s21, %s5217_s21  }
   0x8   : > { %s3308_s26 = sadd.s32 4294967294, %s3969_s24   ;;  %s4084_s27 = sadd.s32 1, %s3969_s24  }
   0x9   : > { %5112 = sst [smem:[#allocation6_spill]] %s4084_s27  ;;  %s382_s28 = sadd.s32 1, %s3965_s23 }
   0xa   : > { %s379_s29 = ssub.s32 %s3969_s24, %s4084_s27  ;;  %p392_p0 = scmp.ne.s32.totalorder %s3965_s23, %s3961_s22 }
   0xb   : > { %p380_p1 = scmp.eq.s32.totalorder %s379_s29, 0  ;;  %p393_p2 = scmp.eq.s32.totalorder %s4080_s25, 1 }
   0xc   : > { %p398_p3 = scmp.ne.s32.totalorder %s3961_s22, %s3957_s21  ;;  %p399_p4 = scmp.eq.s32.totalorder %s3308_s26, 1 }
   0xd   : > { %s4095_s30 = scalar_select %p380_p1, %s3965_s23, %s382_s28  }
   0xe   : > { %p4097_p5 = por %p393_p2, %p392_p0  ;;  %p4101_p6 = por %p399_p4, %p398_p3 }
   0xf   : > { %5113 = sst [smem:[#allocation7_spill]] %s4095_s30  ;;  %p3311_p7 = scmp.ge.s32.totalorder %s3969_s24, 1 }
  0x10   : > { %p477_p8 = scmp.lt.s32.totalorder %s3969_s24, 3 }
  0x12   : > { %p478_p9 = pnand %p3311_p7, %p477_p8 }
  0x14   : > { %481 = sbr.rel (%p478_p9) target bundleno = 2084 (0x824), region = 84 }
  0x19   : > { %s5116_s2 = sld [smem:[#allocation57_spill]]  ;;  %vm733_vm0 = vcmask 1041408   ;;  %s3313_s28 = sshll.u32 %s4080_s25, 5  ;;  %vm684_vm1 = vcmask 293888   ;;  %v3869_v20 = vld [vmem:[%s5090_s4 + $0x8] sm:$0xff]   ;;  %v3870_v21 = vld [vmem:[%s5090_s4] sm:$0xff]  }
  0x1a   : > { %p533_p10 = scmp.lt.s32.totalorder %s3313_s28, 63  ;;  %s5117_s27 = sld [smem:[#allocation55_spill]]  ;;  %3804 = vmatprep.subr.bf16.mxu1 %v3869_v20  ;;  %v3873_v22 = vld [vmem:[%s5092_s6 + $0x34] ss:$8 sps:$4 sm:$0xff]   ;;  %v4166_v25 = vld [vmem:[%s5089_s3] ss:$0 sm:$0xff] }
  0x1b   : > { %3806 = vmatpush3.bf16.msra.mxu1 %v3869_v20  ;;  %vm969_vm2 = vcmask 261120   ;;  %vm1275_vm3 = vcmask 523264   ;;  %s3972_s26 = smov 64   ;;  %s5166_s1 = sld [smem:[#allocation56_spill]] }
  0x1c   : > { %s5220_s28 = smov (!%p533_p10, %s3313_s28), 63  ;;  %3805 = vmatprep.subr.bf16.mxu1 %v3870_v21 }
  0x1d   : > { %s3314_s18 = sshll.u32 %s5220_s28, 2  ;;  %s3488_s28 = sshll.u32 %s4080_s25, 7 }
  0x1e   : > { %s5045_s19 = scalar_lea.hbm %s5102_s16, %s3488_s28 }
  0x1f   : > { %v3850_v0 = vld [vmem:[%s5116_s2 + $0x10] ss:$0 sps:$4 sm:$0x33]   ;;  %v3851_v1 = vld [vmem:[%s5116_s2 + $0x8] sm:$0xff]   ;;  %v3852_v3 = vld [vmem:[%s5116_s2] sm:$0xff]   ;;  %3807 = vmatpush3.bf16.msra.mxu1 %v3870_v21 }
  0x20   : > { %3808 = vmatprep.subr.msk.bf16.mxu0 %vm733_vm0, %v3850_v0  ;;  %v735_v2 = vsel %vm733_vm0, %v3850_v0, 0  ;;  %s4120_s20 = scalar_lea.vmem %s5117_s27, %s3314_s18  ;;  %1332 = vmatprep.subr.bf16.mxu1 %v3873_v22  ;;  %s529_s27 = sand.u32 1, %s3961_s22  }
  0x21   : > { %3611 = vmatpush3.bf16.msra.mxu0 %v735_v2  ;;  %v3853_v4 = vld [vmem:[%s4120_s20] sm:$0xff]   ;;  %v3854_v5 = vld [vmem:[%s4120_s20 + $0x8] sm:$0xff]   ;;  %v3855_v6 = vld [vmem:[%s4120_s20 + $0x10] sm:$0xff]   ;;  %s3312_s30 = sshll.u32 %s529_s27, 3 }
  0x22   : > { %3612 = vmatprep.subr.bf16.mxu0 %v3851_v1  ;;  %3616 = vmatprep.mubr.msk.bf16.mxu0 %vm684_vm1, %v3853_v4  ;;  %v3856_v7 = vld [vmem:[%s4120_s20 + $0x18] sm:$0xff]   ;;  %v3857_v8 = vld [vmem:[%s4120_s20 + $0x20] sm:$0xff]   ;;  %v3858_v9 = vld [vmem:[%s4120_s20 + $0x28] sm:$0xff]   ;;  %s531_s2 = scalar_lea.vmem [#allocation2], %s3312_s30 }
  0x23   : > { %v3859_v10 = vld [vmem:[%s4120_s20 + $0x30] sm:$0xff]   ;;  %v3860_v11 = vld [vmem:[%s4120_s20 + $0x38] sm:$0xff]   ;;  %v3861_v12 = vld [vmem:[%s4120_s20 + $0x40] sm:$0xff]   ;;  %s3237_s29 = sshll.u32 %s531_s2, 4  ;;  %s5047_s29 = int_to_ptr.vmem [resolvable:$true] %s3237_s29 }
  0x24   : > { %v3862_v13 = vld [vmem:[%s4120_s20 + $0x48] sm:$0xff]   ;;  %v3863_v14 = vld [vmem:[%s4120_s20 + $0x50] sm:$0xff]   ;;  %v3864_v15 = vld [vmem:[%s4120_s20 + $0x58] sm:$0xff]  }
  0x25   : > { %3613 = vmatpush3.bf16.msra.mxu0 %v3851_v1  ;;  %v3865_v16 = vld [vmem:[%s4120_s20 + $0x60] sm:$0xff]   ;;  %v3866_v17 = vld [vmem:[%s4120_s20 + $0x68] sm:$0xff]   ;;  %v3867_v18 = vld [vmem:[%s4120_s20 + $0x70] sm:$0xff]  }
  0x26   : > { %3614 = vmatprep.subr.bf16.mxu0 %v3852_v3  ;;  %v3868_v19 = vld [vmem:[%s4120_s20 + $0x78] sm:$0xff]   ;;  %s3224_s20 = scalar_lea.sflag [#allocation3], %s529_s27 }
  0x29   : > { %3615 = vmatpush3.bf16.msra.mxu0 %v3852_v3 }
  0x2a   : > { %3648 = vmatprep.subr.bf16.mxu0 %v3869_v20 }
  0x2c   : > { %3617 = vmatmul.mubr.msk.bf16.vlgmr.msra.gmra.mxu0 %vm684_vm1, %v3854_v5 }
  0x2d   : > { %3620 = vmatprep.mubr.msk.bf16.mxu0 %vm684_vm1, %v3855_v6  ;;  %3649 = vmatpush3.bf16.msra.mxu0 %v3869_v20  ;;  %v3871_v20 = vld [vmem:[%s5092_s6 + $0x30] ss:$8 sps:$4 sm:$0xff]  }
  0x2e   : > { %3650 = vmatprep.subr.bf16.mxu0 %v3870_v21 }
  0x31   : > { %3651 = vmatpush3.bf16.msra.mxu0 %v3870_v21 }
  0x34   : > { %3621 = vmatmul.mubr.msk.bf16.gmra.mxu0 %vm684_vm1, %v3856_v7 }
  0x35   : > { %3624 = vmatprep.mubr.msk.bf16.mxu0 %vm684_vm1, %v3857_v8 }
  0x3c   : > { %3625 = vmatmul.mubr.msk.bf16.gmra.mxu0 %vm684_vm1, %v3858_v9 }
  0x3d   : > { %3628 = vmatprep.mubr.msk.bf16.mxu0 %vm684_vm1, %v3859_v10 }
  0x44   : > { %3629 = vmatmul.mubr.msk.bf16.gmra.mxu0 %vm684_vm1, %v3860_v11 }
  0x45   : > { %3632 = vmatprep.mubr.msk.bf16.mxu0 %vm684_vm1, %v3861_v12 }
  0x4c   : > { %3633 = vmatmul.mubr.msk.bf16.gmra.mxu0 %vm684_vm1, %v3862_v13 }
  0x4d   : > { %3636 = vmatprep.mubr.msk.bf16.mxu0 %vm684_vm1, %v3863_v14 }
  0x54   : > { %3637 = vmatmul.mubr.msk.bf16.gmra.mxu0 %vm684_vm1, %v3864_v15 }
  0x55   : > { %3640 = vmatprep.mubr.msk.bf16.mxu0 %vm684_vm1, %v3865_v16 }
  0x5c   : > { %3641 = vmatmul.mubr.msk.bf16.gmra.mxu0 %vm684_vm1, %v3866_v17 }
  0x5d   : > { %3644 = vmatprep.mubr.msk.bf16.mxu0 %vm684_vm1, %v3867_v18 }
  0x64   : > { %3645 = vmatmul.mubr.msk.bf16.gmra.mxu0 %vm684_vm1, %v3868_v19 }
  0xec   : > { %v3618_v23 = vpop.f32.mrf.mxu0 }
  0xed   : > { %v780_v29 = vadd.f32 %v3618_v23, %v4166_v25 }
  0xee   : > { %v771_v24 = vpop.f32.mrf.mxu0 }
  0xef   : > { %v772_v27 = vadd.f32 %v4166_v25, %v771_v24  ;;  %v900_v36 = vmax.f32 %v780_v29, 0.0 }
  0xf0   : > { %v3619_v26 = vpop.f32.mrf.mxu0 }
  0xf1   : > { %v783_v28 = vadd.f32 %v3619_v26, %v4166_v25  ;;  %v898_v34 = vmax.f32 %v772_v27, 0.0 }
  0xf2   : > { %v774_v30 = vpop.f32.mrf.mxu0 }
  0xf3   : > { %v775_v31 = vadd.f32 %v4166_v25, %v774_v30  ;;  %v901_v32 = vmax.f32 %v783_v28, 0.0 }
  0xf4   : > { %v3622_v33 = vpop.f32.mrf.mxu0 }
  0xf5   : > { %v899_v35 = vmax.f32 %v775_v31, 0.0  ;;  %v796_v37 = vadd.f32 %v3622_v33, %v4166_v25  ;;  %v931_v41 = vpack.c.bf16 %v901_v32, %v900_v36 }
  0xf6   : > { %v787_v38 = vpop.f32.mrf.mxu0 }
  0xf7   : > { %v930_v39 = vpack.c.bf16 %v899_v35, %v898_v34  ;;  %v788_v40 = vadd.f32 %v4166_v25, %v787_v38  ;;  %v904_v44 = vmax.f32 %v796_v37, 0.0 }
  0xf8   : > { %v3623_v42 = vpop.f32.mrf.mxu0 }
  0xf9   : > { %v799_v43 = vadd.f32 %v3623_v42, %v4166_v25  ;;  %3652 = vmatprep.mubr.msk.bf16.mxu0 %vm969_vm2, %v930_v39  ;;  %v902_v46 = vmax.f32 %v788_v40, 0.0 }
  0xfa   : > { %v790_v45 = vpop.f32.mrf.mxu0  ;;  %3653 = vmatmul.mubr.msk.bf16.vlgmr.msra.gmra.mxu0 %vm969_vm2, %v931_v41 }
  0xfb   : > { %v905_v47 = vmax.f32 %v799_v43, 0.0  ;;  %v791_v48 = vadd.f32 %v4166_v25, %v790_v45 }
  0xfc   : > { %v3626_v49 = vpop.f32.mrf.mxu0 }
  0xfd   : > { %v903_v50 = vmax.f32 %v791_v48, 0.0  ;;  %v933_v51 = vpack.c.bf16 %v905_v47, %v904_v44  ;;  %v812_v52 = vadd.f32 %v3626_v49, %v4166_v25 }
  0xfe   : > { %v803_v53 = vpop.f32.mrf.mxu0 }
  0xff   : > { %v932_v54 = vpack.c.bf16 %v903_v50, %v902_v46  ;;  %v804_v55 = vadd.f32 %v4166_v25, %v803_v53  ;;  %v908_v58 = vmax.f32 %v812_v52, 0.0 }
 0x100   : > { %v3627_v56 = vpop.f32.mrf.mxu0 }
 0x101   : > { %3656 = vmatprep.mubr.msk.bf16.mxu0 %vm969_vm2, %v932_v54  ;;  %v815_v57 = vadd.f32 %v3627_v56, %v4166_v25  ;;  %v906_v60 = vmax.f32 %v804_v55, 0.0 }
 0x102   : > { %3657 = vmatmul.mubr.msk.bf16.gmra.mxu0 %vm969_vm2, %v933_v51  ;;  %v806_v59 = vpop.f32.mrf.mxu0 }
 0x103   : > { %v909_v61 = vmax.f32 %v815_v57, 0.0  ;;  %v807_v62 = vadd.f32 %v4166_v25, %v806_v59 }
 0x104   : > { %v3630_v63 = vpop.f32.mrf.mxu0 }
 0x105   : > { %v907_v0 = vmax.f32 %v807_v62, 0.0  ;;  %v935_v1 = vpack.c.bf16 %v909_v61, %v908_v58  ;;  %v828_v2 = vadd.f32 %v3630_v63, %v4166_v25 }
 0x106   : > { %v819_v3 = vpop.f32.mrf.mxu0 }
 0x107   : > { %v934_v4 = vpack.c.bf16 %v907_v0, %v906_v60  ;;  %v820_v5 = vadd.f32 %v4166_v25, %v819_v3  ;;  %v912_v8 = vmax.f32 %v828_v2, 0.0 }
 0x108   : > { %v3631_v6 = vpop.f32.mrf.mxu0 }
 0x109   : > { %3660 = vmatprep.mubr.msk.bf16.mxu0 %vm969_vm2, %v934_v4  ;;  %v831_v7 = vadd.f32 %v3631_v6, %v4166_v25  ;;  %v910_v10 = vmax.f32 %v820_v5, 0.0 }
 0x10a   : > { %3661 = vmatmul.mubr.msk.bf16.gmra.mxu0 %vm969_vm2, %v935_v1  ;;  %v822_v9 = vpop.f32.mrf.mxu0 }
 0x10b   : > { %v913_v11 = vmax.f32 %v831_v7, 0.0  ;;  %v823_v12 = vadd.f32 %v4166_v25, %v822_v9 }
 0x10c   : > { %v3634_v13 = vpop.f32.mrf.mxu0 }
 0x10d   : > { %v911_v14 = vmax.f32 %v823_v12, 0.0  ;;  %v937_v15 = vpack.c.bf16 %v913_v11, %v912_v8  ;;  %v844_v16 = vadd.f32 %v3634_v13, %v4166_v25  ;;  %v3874_v11 = vld [vmem:[%s5092_s6 + $0x20] ss:$8 sps:$4 sm:$0xff]   ;;  %v3877_v12 = vld [vmem:[%s5092_s6 + $0x10] ss:$8 sps:$4 sm:$0xff]  }
 0x10e   : > { %v835_v17 = vpop.f32.mrf.mxu0  ;;  %v3882_v13 = vld [vmem:[%s5092_s6 + $0x4] ss:$8 sps:$4 sm:$0xff]  }
 0x10f   : > { %v936_v18 = vpack.c.bf16 %v911_v14, %v910_v10  ;;  %v836_v19 = vadd.f32 %v4166_v25, %v835_v17  ;;  %v916_v23 = vmax.f32 %v844_v16, 0.0  ;;  %v3876_v10 = vld [vmem:[%s5092_s6 + $0x24] ss:$8 sps:$4 sm:$0xff]   ;;  %v3880_v14 = vld [vmem:[%s5092_s6] ss:$8 sps:$4 sm:$0xff]  }
 0x110   : > { %v3635_v21 = vpop.f32.mrf.mxu0 }
 0x111   : > { %3664 = vmatprep.mubr.msk.bf16.mxu1 %vm969_vm2, %v936_v18  ;;  %v847_v22 = vadd.f32 %v3635_v21, %v4166_v25  ;;  %v914_v26 = vmax.f32 %v836_v19, 0.0  ;;  %v4241_v18 = vld [vmem:[%s5091_s5] ss:$0 sm:$0xff] }
 0x112   : > { %3665 = vmatmul.mubr.msk.bf16.vlgmr.msra.gmra.mxu1 %vm969_vm2, %v937_v15  ;;  %v838_v24 = vpop.f32.mrf.mxu0  ;;  %v5106_v15 = vmov 0  }
 0x113   : > { %v917_v27 = vmax.f32 %v847_v22, 0.0  ;;  %v839_v28 = vadd.f32 %v4166_v25, %v838_v24  ;;  %1333 = vmatpush1.bf16.msra.mxu1 %v3871_v20 }
 0x114   : > { %v3638_v29 = vpop.f32.mrf.mxu0  ;;  %1334 = vmatprep.subr.bf16.mxu1 %v3876_v10 }
 0x115   : > { %v915_v30 = vmax.f32 %v839_v28, 0.0  ;;  %v939_v31 = vpack.c.bf16 %v917_v27, %v916_v23  ;;  %v860_v32 = vadd.f32 %v3638_v29, %v4166_v25 }
 0x116   : > { %v851_v33 = vpop.f32.mrf.mxu0 }
 0x117   : > { %v938_v34 = vpack.c.bf16 %v915_v30, %v914_v26  ;;  %v852_v35 = vadd.f32 %v4166_v25, %v851_v33  ;;  %v920_v38 = vmax.f32 %v860_v32, 0.0  ;;  %1335 = vmatpush1.bf16.msra.mxu1 %v3874_v11 }
 0x118   : > { %v3639_v36 = vpop.f32.mrf.mxu0 }
 0x119   : > { %3668 = vmatprep.mubr.msk.bf16.mxu1 %vm969_vm2, %v938_v34  ;;  %v863_v37 = vadd.f32 %v3639_v36, %v4166_v25  ;;  %v918_v40 = vmax.f32 %v852_v35, 0.0 }
 0x11a   : > { %3669 = vmatmul.mubr.msk.bf16.gmra.mxu1 %vm969_vm2, %v939_v31  ;;  %v854_v39 = vpop.f32.mrf.mxu0 }
 0x11b   : > { %v921_v41 = vmax.f32 %v863_v37, 0.0  ;;  %v855_v42 = vadd.f32 %v4166_v25, %v854_v39 }
 0x11c   : > { %v3642_v43 = vpop.f32.mrf.mxu0 }
 0x11d   : > { %v919_v44 = vmax.f32 %v855_v42, 0.0  ;;  %v941_v45 = vpack.c.bf16 %v921_v41, %v920_v38  ;;  %v876_v46 = vadd.f32 %v3642_v43, %v4166_v25 }
 0x11e   : > { %v867_v47 = vpop.f32.mrf.mxu0 }
 0x11f   : > { %v940_v48 = vpack.c.bf16 %v919_v44, %v918_v40  ;;  %v868_v49 = vadd.f32 %v4166_v25, %v867_v47  ;;  %v924_v52 = vmax.f32 %v876_v46, 0.0 }
 0x120   : > { %v3643_v50 = vpop.f32.mrf.mxu0 }
 0x121   : > { %3672 = vmatprep.mubr.msk.bf16.mxu1 %vm969_vm2, %v940_v48  ;;  %v879_v51 = vadd.f32 %v3643_v50, %v4166_v25  ;;  %v922_v54 = vmax.f32 %v868_v49, 0.0 }
 0x122   : > { %3673 = vmatmul.mubr.msk.bf16.gmra.mxu1 %vm969_vm2, %v941_v45  ;;  %v870_v53 = vpop.f32.mrf.mxu0 }
 0x123   : > { %v925_v55 = vmax.f32 %v879_v51, 0.0  ;;  %v871_v56 = vadd.f32 %v4166_v25, %v870_v53 }
 0x124   : > { %v3646_v57 = vpop.f32.mrf.mxu0 }
 0x125   : > { %v923_v58 = vmax.f32 %v871_v56, 0.0  ;;  %v943_v59 = vpack.c.bf16 %v925_v55, %v924_v52  ;;  %v892_v60 = vadd.f32 %v3646_v57, %v4166_v25 }
 0x126   : > { %v883_v61 = vpop.f32.mrf.mxu0 }
 0x127   : > { %v942_v62 = vpack.c.bf16 %v923_v58, %v922_v54  ;;  %v884_v63 = vadd.f32 %v4166_v25, %v883_v61  ;;  %v928_v2 = vmax.f32 %v892_v60, 0.0 }
 0x128   : > { %v3647_v0 = vpop.f32.mrf.mxu0 }
 0x129   : > { %3676 = vmatprep.mubr.msk.bf16.mxu1 %vm969_vm2, %v942_v62  ;;  %v895_v1 = vadd.f32 %v3647_v0, %v4166_v25  ;;  %v926_v4 = vmax.f32 %v884_v63, 0.0 }
 0x12a   : > { %3677 = vmatmul.mubr.msk.bf16.gmra.mxu1 %vm969_vm2, %v943_v59  ;;  %v886_v3 = vpop.f32.mrf.mxu0 }
 0x12b   : > { %v929_v5 = vmax.f32 %v895_v1, 0.0  ;;  %v887_v6 = vadd.f32 %v4166_v25, %v886_v3  ;;  %v3879_v25 = vld [vmem:[%s5092_s6 + $0x14] ss:$8 sps:$4 sm:$0xff]  }
 0x12c   : > { %1336 = vmatprep.subr.bf16.mxu1 %v3879_v25 }
 0x12d   : > { %v927_v7 = vmax.f32 %v887_v6, 0.0  ;;  %v945_v8 = vpack.c.bf16 %v929_v5, %v928_v2  ;;  %1337 = vmatpush1.bf16.msra.mxu1 %v3877_v12 }
 0x12e   : > { %1338 = vmatprep.subr.bf16.mxu1 %v3882_v13 }
 0x12f   : > { %v944_v9 = vpack.c.bf16 %v927_v7, %v926_v4 }
 0x131   : > { %3680 = vmatprep.mubr.msk.bf16.mxu1 %vm969_vm2, %v944_v9  ;;  %1339 = vmatpush1.bf16.msra.mxu1 %v3880_v14 }
 0x132   : > { %3681 = vmatmul.mubr.msk.bf16.gmra.mxu1 %vm969_vm2, %v945_v8 }
 0x133   : > { %1356 = vmatprep.mubr.bf16.mxu1 %v5106_v15 }
 0x1ba   : > { %v3654_v16 = vpop.f32.mrf.mxu0 }
 0x1bb   : > { %v1061_v31 = vadd.f32 %v3654_v16, %v4241_v18 }
 0x1bc   : > { %v1052_v17 = vpop.f32.mrf.mxu0 }
 0x1bd   : > { %v1053_v20 = vadd.f32 %v4241_v18, %v1052_v17  ;;  %v1181_v34 = vmax.f32 %v1061_v31, 0.0 }
 0x1be   : > { %v3655_v19 = vpop.f32.mrf.mxu0 }
 0x1bf   : > { %v1179_v24 = vmax.f32 %v1053_v20, 0.0  ;;  %v1064_v28 = vadd.f32 %v3655_v19, %v4241_v18 }
 0x1c0   : > { %v1055_v21 = vpop.f32.mrf.mxu0 }
 0x1c1   : > { %v1056_v22 = vadd.f32 %v4241_v18, %v1055_v21  ;;  %v1182_v32 = vmax.f32 %v1064_v28, 0.0 }
 0x1c2   : > { %v3658_v23 = vpop.f32.mrf.mxu0 }
 0x1c3   : > { %v1180_v26 = vmax.f32 %v1056_v22, 0.0  ;;  %v1212_v35 = vpack.c.bf16 %v1182_v32, %v1181_v34  ;;  %v1077_v45 = vadd.f32 %v3658_v23, %v4241_v18  ;;  %v3884_v34 = vld [vmem:[%s5094_s8 + $0x10] sm:$0xff]  }
 0x1c4   : > { %v1068_v27 = vpop.f32.mrf.mxu0 }
 0x1c5   : > { %v1211_v29 = vpack.c.bf16 %v1180_v26, %v1179_v24  ;;  %v1069_v38 = vadd.f32 %v4241_v18, %v1068_v27  ;;  %v1185_v48 = vmax.f32 %v1077_v45, 0.0 }
 0x1c6   : > { %v3659_v30 = vpop.f32.mrf.mxu0 }
 0x1c7   : > { %3380 = vmatmul.mubr.msk.bf16.vlgmr.msra.gmra.mxu1 %vm1275_vm3, %v1211_v29  ;;  %v1183_v41 = vmax.f32 %v1069_v38, 0.0  ;;  %v1080_v42 = vadd.f32 %v3659_v30, %v4241_v18  ;;  %v3883_v29 = vld [vmem:[%s5094_s8 + $0x18] sm:$0xff]   ;;  %v3885_v38 = vld [vmem:[%s5094_s8 + $0x8] sm:$0xff]  }
 0x1c8   : > { %1366 = vmatprep.mubr.bf16.mxu1 %v5106_v15  ;;  %v1071_v33 = vpop.f32.mrf.mxu0  ;;  %3684 = vmatprep.subr.bf16.mxu0 %v3883_v29 }
 0x1c9   : > { %v1072_v36 = vadd.f32 %v4241_v18, %v1071_v33  ;;  %v1186_v46 = vmax.f32 %v1080_v42, 0.0  ;;  %3685 = vmatpush3.bf16.msra.mxu0 %v3883_v29 }
 0x1ca   : > { %v3662_v37 = vpop.f32.mrf.mxu0  ;;  %3686 = vmatprep.subr.bf16.mxu0 %v3884_v34 }
 0x1cb   : > { %v1184_v39 = vmax.f32 %v1072_v36, 0.0  ;;  %v1214_v49 = vpack.c.bf16 %v1186_v46, %v1185_v48  ;;  %v1093_v56 = vadd.f32 %v3662_v37, %v4241_v18 }
 0x1cc   : > { %v1084_v40 = vpop.f32.mrf.mxu0 }
 0x1cd   : > { %v1213_v43 = vpack.c.bf16 %v1184_v39, %v1183_v41  ;;  %v1085_v50 = vadd.f32 %v4241_v18, %v1084_v40  ;;  %v1189_v60 = vmax.f32 %v1093_v56, 0.0  ;;  %3687 = vmatpush3.bf16.msra.mxu0 %v3884_v34 }
 0x1ce   : > { %v3663_v44 = vpop.f32.mrf.mxu0  ;;  %3688 = vmatprep.subr.bf16.mxu0 %v3885_v38 }
 0x1cf   : > { %3381 = vmatmul.mubr.msk.bf16.gmra.mxu1 %vm1275_vm3, %v1212_v35  ;;  %v1187_v53 = vmax.f32 %v1085_v50, 0.0  ;;  %v1096_v57 = vadd.f32 %v3663_v44, %v4241_v18 }
 0x1d0   : > { %1376 = vmatprep.mubr.bf16.mxu1 %v5106_v15  ;;  %v1087_v47 = vpop.f32.mrf.mxu0 }
 0x1d1   : > { %v1088_v51 = vadd.f32 %v4241_v18, %v1087_v47  ;;  %v1190_v61 = vmax.f32 %v1096_v57, 0.0  ;;  %3689 = vmatpush3.bf16.msra.mxu0 %v3885_v38 }
 0x1d2   : > { %v3666_v52 = vpop.f32.mrf.mxu1 }
 0x1d3   : > { %v1188_v54 = vmax.f32 %v1088_v51, 0.0  ;;  %v1216_v63 = vpack.c.bf16 %v1190_v61, %v1189_v60  ;;  %v1109_v6 = vadd.f32 %v3666_v52, %v4241_v18 }
 0x1d4   : > { %v1100_v55 = vpop.f32.mrf.mxu1 }
 0x1d5   : > { %v1215_v58 = vpack.c.bf16 %v1188_v54, %v1187_v53  ;;  %v1101_v0 = vadd.f32 %v4241_v18, %v1100_v55  ;;  %v1193_v10 = vmax.f32 %v1109_v6, 0.0 }
 0x1d6   : > { %v3667_v59 = vpop.f32.mrf.mxu1 }
 0x1d7   : > { %3382 = vmatmul.mubr.msk.bf16.gmra.mxu1 %vm1275_vm3, %v1213_v43  ;;  %v1191_v3 = vmax.f32 %v1101_v0, 0.0  ;;  %v1112_v7 = vadd.f32 %v3667_v59, %v4241_v18  ;;  %v3886_v43 = vld [vmem:[%s5094_s8] sm:$0xff]  }
 0x1d8   : > { %1386 = vmatprep.mubr.bf16.mxu1 %v5106_v15  ;;  %v1103_v62 = vpop.f32.mrf.mxu1  ;;  %3690 = vmatprep.subr.bf16.mxu0 %v3886_v43 }
 0x1d9   : > { %v1104_v1 = vadd.f32 %v4241_v18, %v1103_v62  ;;  %v1194_v11 = vmax.f32 %v1112_v7, 0.0  ;;  %3691 = vmatpush3.bf16.msra.mxu0 %v3886_v43 }
 0x1da   : > { %v3670_v2 = vpop.f32.mrf.mxu1 }
 0x1db   : > { %v1192_v4 = vmax.f32 %v1104_v1, 0.0  ;;  %v1218_v12 = vpack.c.bf16 %v1194_v11, %v1193_v10  ;;  %v1125_v21 = vadd.f32 %v3670_v2, %v4241_v18  ;;  %v4325_v10 = vld [vmem:[%s5093_s7] ss:$0 sm:$0xff] }
 0x1dc   : > { %v1116_v5 = vpop.f32.mrf.mxu1 }
 0x1dd   : > { %v1217_v8 = vpack.c.bf16 %v1192_v4, %v1191_v3  ;;  %v1117_v13 = vadd.f32 %v4241_v18, %v1116_v5  ;;  %v1197_v26 = vmax.f32 %v1125_v21, 0.0 }
 0x1de   : > { %v3671_v9 = vpop.f32.mrf.mxu1 }
 0x1df   : > { %3383 = vmatmul.mubr.msk.bf16.gmra.mxu1 %vm1275_vm3, %v1214_v49  ;;  %v1195_v17 = vmax.f32 %v1117_v13, 0.0  ;;  %v1128_v22 = vadd.f32 %v3671_v9, %v4241_v18 }
 0x1e0   : > { %1396 = vmatprep.mubr.bf16.mxu1 %v5106_v15  ;;  %v1119_v25 = vpop.f32.mrf.mxu1 }
 0x1e1   : > { %v1120_v14 = vadd.f32 %v4241_v18, %v1119_v25  ;;  %v1198_v27 = vmax.f32 %v1128_v22, 0.0  ;;  %v3889_v25 = vld [vmem:[%s5096_s10 + $0x34] ss:$8 sps:$4 sm:$0xff]  }
 0x1e2   : > { %v3674_v16 = vpop.f32.mrf.mxu1  ;;  %2004 = vmatprep.subr.bf16.mxu0 %v3889_v25 }
 0x1e3   : > { %v1196_v19 = vmax.f32 %v1120_v14, 0.0  ;;  %v1220_v30 = vpack.c.bf16 %v1198_v27, %v1197_v26  ;;  %v1141_v39 = vadd.f32 %v3674_v16, %v4241_v18 }
 0x1e4   : > { %v1132_v20 = vpop.f32.mrf.mxu1 }
 0x1e5   : > { %v1219_v23 = vpack.c.bf16 %v1196_v19, %v1195_v17  ;;  %v1133_v31 = vadd.f32 %v4241_v18, %v1132_v20  ;;  %v1201_v44 = vmax.f32 %v1141_v39, 0.0 }
 0x1e6   : > { %v3675_v24 = vpop.f32.mrf.mxu1 }
 0x1e7   : > { %3384 = vmatmul.mubr.msk.bf16.gmra.mxu1 %vm1275_vm3, %v1215_v58  ;;  %v1199_v35 = vmax.f32 %v1133_v31, 0.0  ;;  %v1144_v40 = vadd.f32 %v3675_v24, %v4241_v18 }
 0x1e8   : > { %1406 = vmatprep.mubr.bf16.mxu1 %v5106_v15  ;;  %v1135_v28 = vpop.f32.mrf.mxu1 }
 0x1e9   : > { %v1136_v32 = vadd.f32 %v4241_v18, %v1135_v28  ;;  %v1202_v45 = vmax.f32 %v1144_v40, 0.0 }
 0x1ea   : > { %v3678_v33 = vpop.f32.mrf.mxu1 }
 0x1eb   : > { %v1200_v36 = vmax.f32 %v1136_v32, 0.0  ;;  %v1222_v47 = vpack.c.bf16 %v1202_v45, %v1201_v44  ;;  %v1157_v54 = vadd.f32 %v3678_v33, %v4241_v18 }
 0x1ec   : > { %v1148_v37 = vpop.f32.mrf.mxu1 }
 0x1ed   : > { %v1221_v41 = vpack.c.bf16 %v1200_v36, %v1199_v35  ;;  %v1149_v48 = vadd.f32 %v4241_v18, %v1148_v37  ;;  %v1205_v58 = vmax.f32 %v1157_v54, 0.0 }
 0x1ee   : > { %v3679_v42 = vpop.f32.mrf.mxu1 }
 0x1ef   : > { %3385 = vmatmul.mubr.msk.bf16.gmra.mxu1 %vm1275_vm3, %v1216_v63  ;;  %v1203_v51 = vmax.f32 %v1149_v48, 0.0  ;;  %v1160_v55 = vadd.f32 %v3679_v42, %v4241_v18 }
 0x1f0   : > { %1416 = vmatprep.mubr.bf16.mxu1 %v5106_v15  ;;  %v1151_v46 = vpop.f32.mrf.mxu1 }
 0x1f1   : > { %v1152_v49 = vadd.f32 %v4241_v18, %v1151_v46  ;;  %v1206_v59 = vmax.f32 %v1160_v55, 0.0 }
 0x1f2   : > { %v3682_v50 = vpop.f32.mrf.mxu1 }
 0x1f3   : > { %v1204_v52 = vmax.f32 %v1152_v49, 0.0  ;;  %v1224_v61 = vpack.c.bf16 %v1206_v59, %v1205_v58  ;;  %v1173_v2 = vadd.f32 %v3682_v50, %v4241_v18 }
 0x1f4   : > { %v1164_v53 = vpop.f32.mrf.mxu1 }
 0x1f5   : > { %v1223_v56 = vpack.c.bf16 %v1204_v52, %v1203_v51  ;;  %v1165_v62 = vadd.f32 %v4241_v18, %v1164_v53  ;;  %v1209_v5 = vmax.f32 %v1173_v2, 0.0 }
 0x1f6   : > { %v3683_v57 = vpop.f32.mrf.mxu1 }
 0x1f7   : > { %3386 = vmatmul.mubr.msk.bf16.gmra.mxu1 %vm1275_vm3, %v1217_v8  ;;  %v1207_v0 = vmax.f32 %v1165_v62, 0.0  ;;  %v1176_v3 = vadd.f32 %v3683_v57, %v4241_v18 }
 0x1f8   : > { %1426 = vmatprep.mubr.bf16.mxu1 %v5106_v15  ;;  %v1167_v60 = vpop.f32.mrf.mxu1 }
 0x1f9   : > { %v1168_v63 = vadd.f32 %v4241_v18, %v1167_v60  ;;  %v1210_v6 = vmax.f32 %v1176_v3, 0.0 }
 0x1fb   : > { %v1208_v1 = vmax.f32 %v1168_v63, 0.0  ;;  %v1226_v7 = vpack.c.bf16 %v1210_v6, %v1209_v5 }
 0x1fd   : > { %v1225_v4 = vpack.c.bf16 %v1208_v1, %v1207_v0 }
 0x1ff   : > { %3387 = vmatmul.mubr.msk.bf16.gmra.mxu1 %vm1275_vm3, %v1218_v12 }
 0x200   : > { %1436 = vmatprep.mubr.bf16.mxu1 %v5106_v15 }
 0x207   : > { %3388 = vmatmul.mubr.msk.bf16.gmra.mxu1 %vm1275_vm3, %v1219_v23 }
 0x208   : > { %1446 = vmatprep.mubr.bf16.mxu1 %v5106_v15 }
 0x20f   : > { %3389 = vmatmul.mubr.msk.bf16.gmra.mxu1 %vm1275_vm3, %v1220_v30  ;;  %v3887_v30 = vld [vmem:[%s5096_s10 + $0x30] ss:$8 sps:$4 sm:$0xff]  }
 0x210   : > { %1456 = vmatprep.mubr.bf16.mxu1 %v5106_v15 }
 0x217   : > { %3390 = vmatmul.mubr.msk.bf16.gmra.mxu1 %vm1275_vm3, %v1221_v41 }
 0x218   : > { %1466 = vmatprep.mubr.bf16.mxu1 %v5106_v15 }
 0x21f   : > { %3391 = vmatmul.mubr.msk.bf16.gmra.mxu1 %vm1275_vm3, %v1222_v47 }
 0x220   : > { %1476 = vmatprep.mubr.bf16.mxu1 %v5106_v15 }
 0x227   : > { %3392 = vmatmul.mubr.msk.bf16.gmra.mxu1 %vm1275_vm3, %v1223_v56 }
 0x228   : > { %1486 = vmatprep.mubr.bf16.mxu1 %v5106_v15 }
 0x22f   : > { %3393 = vmatmul.mubr.msk.bf16.gmra.mxu1 %vm1275_vm3, %v1224_v61 }
 0x230   : > { %1496 = vmatprep.mubr.bf16.mxu1 %v5106_v15 }
 0x237   : > { %3394 = vmatmul.mubr.msk.bf16.gmra.mxu1 %vm1275_vm3, %v1225_v4 }
 0x238   : > { %1506 = vmatprep.mubr.bf16.mxu1 %v5106_v15 }
 0x23f   : > { %3395 = vmatmul.mubr.msk.bf16.gmra.mxu1 %vm1275_vm3, %v1226_v7 }
 0x287   : > { %v4318_v8 = vpop.f32.mrf.mxu1 }
 0x289   : > { %v4320_v9 = vpop.f32.mrf.mxu1 }
 0x28a   : > { %v1524_v11 = vadd.f32 %v4325_v10, %v4320_v9 }
 0x28b   : > { %v4327_v18 = vpop.f32.mrf.mxu1 }
 0x28c   : > { %v1556_v16 = vmax.f32 %v1524_v11, 0.0 }
 0x28d   : > { %v4334_v12 = vpop.f32.mrf.mxu1 }
 0x28e   : > { %v1525_v13 = vadd.f32 %v4325_v10, %v4334_v12 }
 0x28f   : > { %v4338_v14 = vpop.f32.mrf.mxu1 }
 0x290   : > { %v1557_v17 = vmax.f32 %v1525_v13, 0.0 }
 0x291   : > { %v4340_v19 = vpop.f32.mrf.mxu1 }
 0x292   : > { %v1588_v20 = vpack.c.bf16 %v1557_v17, %v1556_v16  ;;  %v1526_v22 = vadd.f32 %v4325_v10, %v4340_v19 }
 0x293   : > { %v4342_v21 = vpop.f32.mrf.mxu1 }
 0x294   : > { %3692 = vmatprep.mubr.msk.bf16.mxu0 %vm1275_vm3, %v1588_v20  ;;  %v1558_v27 = vmax.f32 %v1526_v22, 0.0 }
 0x295   : > { %v4347_v23 = vpop.f32.mrf.mxu1 }
 0x296   : > { %v1527_v24 = vadd.f32 %v4325_v10, %v4347_v23 }
 0x297   : > { %v4351_v26 = vpop.f32.mrf.mxu1 }
 0x298   : > { %v1559_v28 = vmax.f32 %v1527_v24, 0.0 }
 0x299   : > { %v4353_v29 = vpop.f32.mrf.mxu1 }
 0x29a   : > { %v1589_v31 = vpack.c.bf16 %v1559_v28, %v1558_v27  ;;  %v1528_v33 = vadd.f32 %v4325_v10, %v4353_v29 }
 0x29b   : > { %v4358_v32 = vpop.f32.mrf.mxu1 }
 0x29c   : > { %3693 = vmatmul.mubr.msk.bf16.vlgmr.msra.gmra.mxu0 %vm1275_vm3, %v1589_v31  ;;  %v1560_v37 = vmax.f32 %v1528_v33, 0.0 }
 0x29d   : > { %v4363_v34 = vpop.f32.mrf.mxu1  ;;  %2005 = vmatpush1.bf16.msra.mxu0 %v3887_v30 }
 0x29e   : > { %v1529_v35 = vadd.f32 %v4325_v10, %v4363_v34 }
 0x29f   : > { %v4367_v36 = vpop.f32.mrf.mxu1 }
 0x2a0   : > { %v1561_v38 = vmax.f32 %v1529_v35, 0.0 }
 0x2a1   : > { %v4369_v39 = vpop.f32.mrf.mxu1 }
 0x2a2   : > { %v1590_v40 = vpack.c.bf16 %v1561_v38, %v1560_v37  ;;  %v1530_v42 = vadd.f32 %v4325_v10, %v4369_v39 }
 0x2a3   : > { %v4371_v41 = vpop.f32.mrf.mxu1 }
 0x2a4   : > { %3696 = vmatprep.mubr.msk.bf16.mxu0 %vm1275_vm3, %v1590_v40  ;;  %v1562_v46 = vmax.f32 %v1530_v42, 0.0 }
 0x2a5   : > { %v4376_v43 = vpop.f32.mrf.mxu1 }
 0x2a6   : > { %v1531_v44 = vadd.f32 %v4325_v10, %v4376_v43 }
 0x2a7   : > { %v4380_v45 = vpop.f32.mrf.mxu1 }
 0x2a8   : > { %5118 = vst [vmem:[#allocation8_spill] sm:$0xff] %v4380_v45  ;;  %v1563_v47 = vmax.f32 %v1531_v44, 0.0 }
 0x2a9   : > { %v4382_v48 = vpop.f32.mrf.mxu1 }
 0x2aa   : > { %v1591_v49 = vpack.c.bf16 %v1563_v47, %v1562_v46  ;;  %v1532_v51 = vadd.f32 %v4325_v10, %v4382_v48 }
 0x2ab   : > { %v4384_v50 = vpop.f32.mrf.mxu1 }
 0x2ac   : > { %5119 = vst [vmem:[#allocation9_spill] sm:$0xff] %v4384_v50  ;;  %3697 = vmatmul.mubr.msk.bf16.gmra.mxu0 %vm1275_vm3, %v1591_v49  ;;  %v1564_v55 = vmax.f32 %v1532_v51, 0.0 }
 0x2ad   : > { %v4389_v52 = vpop.f32.mrf.mxu1 }
 0x2ae   : > { %v1533_v53 = vadd.f32 %v4325_v10, %v4389_v52 }
 0x2af   : > { %v4393_v54 = vpop.f32.mrf.mxu1 }
 0x2b0   : > { %v1565_v56 = vmax.f32 %v1533_v53, 0.0 }
 0x2b1   : > { %v4395_v57 = vpop.f32.mrf.mxu1 }
 0x2b2   : > { %v1592_v58 = vpack.c.bf16 %v1565_v56, %v1564_v55  ;;  %v1534_v60 = vadd.f32 %v4325_v10, %v4395_v57 }
 0x2b3   : > { %v4397_v59 = vpop.f32.mrf.mxu1 }
 0x2b4   : > { %5120 = vst [vmem:[#allocation10_spill] sm:$0xff] %v4397_v59  ;;  %3700 = vmatprep.mubr.msk.bf16.mxu0 %vm1275_vm3, %v1592_v58  ;;  %v1566_v0 = vmax.f32 %v1534_v60, 0.0 }
 0x2b5   : > { %v4402_v61 = vpop.f32.mrf.mxu1 }
 0x2b6   : > { %v1535_v62 = vadd.f32 %v4325_v10, %v4402_v61 }
 0x2b7   : > { %v4406_v63 = vpop.f32.mrf.mxu1 }
 0x2b8   : > { %5121 = vst [vmem:[#allocation11_spill] sm:$0xff] %v4406_v63  ;;  %v1567_v1 = vmax.f32 %v1535_v62, 0.0 }
 0x2b9   : > { %v4408_v2 = vpop.f32.mrf.mxu1 }
 0x2ba   : > { %v1593_v3 = vpack.c.bf16 %v1567_v1, %v1566_v0  ;;  %v1536_v5 = vadd.f32 %v4325_v10, %v4408_v2 }
 0x2bb   : > { %v4410_v4 = vpop.f32.mrf.mxu1 }
 0x2bc   : > { %5122 = vst [vmem:[#allocation12_spill] sm:$0xff] %v4410_v4  ;;  %3701 = vmatmul.mubr.msk.bf16.gmra.mxu0 %vm1275_vm3, %v1593_v3  ;;  %v1568_v25 = vmax.f32 %v1536_v5, 0.0 }
 0x2bd   : > { %v4415_v6 = vpop.f32.mrf.mxu1 }
 0x2be   : > { %v1537_v7 = vadd.f32 %v4325_v10, %v4415_v6 }
 0x2bf   : > { %v4419_v11 = vpop.f32.mrf.mxu1 }
 0x2c0   : > { %5123 = vst [vmem:[#allocation13_spill] sm:$0xff] %v4419_v11  ;;  %v1569_v13 = vmax.f32 %v1537_v7, 0.0  ;;  %v3892_v7 = vld [vmem:[%s5096_s10 + $0x24] ss:$8 sps:$4 sm:$0xff]  }
 0x2c1   : > { %v4421_v16 = vpop.f32.mrf.mxu1  ;;  %2006 = vmatprep.subr.bf16.mxu0 %v3892_v7 }
 0x2c2   : > { %v1594_v17 = vpack.c.bf16 %v1569_v13, %v1568_v25  ;;  %v1538_v22 = vadd.f32 %v4325_v10, %v4421_v16  ;;  %v3890_v13 = vld [vmem:[%s5096_s10 + $0x20] ss:$8 sps:$4 sm:$0xff]  }
 0x2c3   : > { %v4423_v20 = vpop.f32.mrf.mxu1  ;;  %2007 = vmatpush1.bf16.msra.mxu0 %v3890_v13 }
 0x2c4   : > { %5124 = vst [vmem:[#allocation14_spill] sm:$0xff] %v4423_v20  ;;  %3704 = vmatprep.mubr.msk.bf16.mxu0 %vm1275_vm3, %v1594_v17  ;;  %v1570_v30 = vmax.f32 %v1538_v22, 0.0 }
 0x2c5   : > { %v4428_v24 = vpop.f32.mrf.mxu1 }
 0x2c6   : > { %v1539_v27 = vadd.f32 %v4325_v10, %v4428_v24 }
 0x2c7   : > { %v4432_v28 = vpop.f32.mrf.mxu1 }
 0x2c8   : > { %5125 = vst [vmem:[#allocation15_spill] sm:$0xff] %v4432_v28  ;;  %v1571_v31 = vmax.f32 %v1539_v27, 0.0 }
 0x2c9   : > { %v4434_v33 = vpop.f32.mrf.mxu1 }
 0x2ca   : > { %v1595_v35 = vpack.c.bf16 %v1571_v31, %v1570_v30  ;;  %v1540_v38 = vadd.f32 %v4325_v10, %v4434_v33  ;;  %v3895_v30 = vld [vmem:[%s5096_s10 + $0x14] ss:$8 sps:$4 sm:$0xff]  }
 0x2cb   : > { %v4436_v37 = vpop.f32.mrf.mxu1  ;;  %2008 = vmatprep.subr.bf16.mxu0 %v3895_v30 }
 0x2cc   : > { %5126 = vst [vmem:[#allocation16_spill] sm:$0xff] %v4436_v37  ;;  %3705 = vmatmul.mubr.msk.bf16.gmra.mxu0 %vm1275_vm3, %v1595_v35  ;;  %v1572_v46 = vmax.f32 %v1540_v38, 0.0  ;;  %v3893_v38 = vld [vmem:[%s5096_s10 + $0x10] ss:$8 sps:$4 sm:$0xff]  }
 0x2cd   : > { %v4441_v40 = vpop.f32.mrf.mxu1  ;;  %2009 = vmatpush1.bf16.msra.mxu0 %v3893_v38 }
 0x2ce   : > { %v1541_v42 = vadd.f32 %v4325_v10, %v4441_v40 }
 0x2cf   : > { %v4445_v44 = vpop.f32.mrf.mxu1 }
 0x2d0   : > { %5127 = vst [vmem:[#allocation17_spill] sm:$0xff] %v4445_v44  ;;  %v1573_v47 = vmax.f32 %v1541_v42, 0.0 }
 0x2d1   : > { %v4447_v49 = vpop.f32.mrf.mxu1 }
 0x2d2   : > { %v1596_v51 = vpack.c.bf16 %v1573_v47, %v1572_v46  ;;  %v1542_v55 = vadd.f32 %v4325_v10, %v4447_v49 }
 0x2d3   : > { %v4449_v53 = vpop.f32.mrf.mxu1 }
 0x2d4   : > { %5128 = vst [vmem:[#allocation18_spill] sm:$0xff] %v4449_v53  ;;  %3708 = vmatprep.mubr.msk.bf16.mxu0 %vm1275_vm3, %v1596_v51  ;;  %v1574_v62 = vmax.f32 %v1542_v55, 0.0  ;;  %v3898_v51 = vld [vmem:[%s5096_s10 + $0x4] ss:$8 sps:$4 sm:$0xff]  }
 0x2d5   : > { %v4454_v56 = vpop.f32.mrf.mxu1  ;;  %2010 = vmatprep.subr.bf16.mxu0 %v3898_v51 }
 0x2d6   : > { %v1543_v58 = vadd.f32 %v4325_v10, %v4454_v56 }
 0x2d7   : > { %v4458_v60 = vpop.f32.mrf.mxu1 }
 0x2d8   : > { %5129 = vst [vmem:[#allocation19_spill] sm:$0xff] %v4458_v60  ;;  %v1575_v0 = vmax.f32 %v1543_v58, 0.0  ;;  %v3896_v58 = vld [vmem:[%s5096_s10] ss:$8 sps:$4 sm:$0xff]  }
 0x2d9   : > { %v4460_v1 = vpop.f32.mrf.mxu1  ;;  %2011 = vmatpush1.bf16.msra.mxu0 %v3896_v58 }
 0x2da   : > { %v1597_v3 = vpack.c.bf16 %v1575_v0, %v1574_v62  ;;  %v1544_v25 = vadd.f32 %v4325_v10, %v4460_v1 }
 0x2db   : > { %v4462_v5 = vpop.f32.mrf.mxu1 }
 0x2dc   : > { %5130 = vst [vmem:[#allocation20_spill] sm:$0xff] %v4462_v5  ;;  %3709 = vmatmul.mubr.msk.bf16.gmra.mxu0 %vm1275_vm3, %v1597_v3  ;;  %v1576_v31 = vmax.f32 %v1544_v25, 0.0 }
 0x2dd   : > { %v4473_v17 = vpop.f32.mrf.mxu1 }
 0x2de   : > { %v1545_v22 = vadd.f32 %v4325_v10, %v4473_v17 }
 0x2df   : > { %v4477_v27 = vpop.f32.mrf.mxu1 }
 0x2e0   : > { %5131 = vst [vmem:[#allocation21_spill] sm:$0xff] %v4477_v27  ;;  %v1577_v35 = vmax.f32 %v1545_v22, 0.0 }
 0x2e1   : > { %v4485_v42 = vpop.f32.mrf.mxu1 }
 0x2e2   : > { %v1598_v46 = vpack.c.bf16 %v1577_v35, %v1576_v31  ;;  %v1546_v55 = vadd.f32 %v4325_v10, %v4485_v42 }
 0x2e3   : > { %v4487_v47 = vpop.f32.mrf.mxu1 }
 0x2e4   : > { %5132 = vst [vmem:[#allocation22_spill] sm:$0xff] %v4487_v47  ;;  %3712 = vmatprep.mubr.msk.bf16.mxu0 %vm1275_vm3, %v1598_v46  ;;  %v1578_v7 = vmax.f32 %v1546_v55, 0.0 }
 0x2e5   : > { %v4498_v62 = vpop.f32.mrf.mxu1 }
 0x2e6   : > { %v1547_v0 = vadd.f32 %v4325_v10, %v4498_v62 }
 0x2e7   : > { %v4502_v3 = vpop.f32.mrf.mxu1 }
 0x2e8   : > { %5133 = vst [vmem:[#allocation23_spill] sm:$0xff] %v4502_v3  ;;  %v1579_v25 = vmax.f32 %v1547_v0, 0.0 }
 0x2e9   : > { %v4504_v13 = vpop.f32.mrf.mxu1 }
 0x2ea   : > { %v1599_v22 = vpack.c.bf16 %v1579_v25, %v1578_v7  ;;  %v1548_v31 = vadd.f32 %v4325_v10, %v4504_v13 }
 0x2eb   : > { %v4506_v30 = vpop.f32.mrf.mxu1 }
 0x2ec   : > { %5134 = vst [vmem:[#allocation24_spill] sm:$0xff] %v4506_v30  ;;  %3713 = vmatmul.mubr.msk.bf16.gmra.mxu0 %vm1275_vm3, %v1599_v22  ;;  %v1580_v51 = vmax.f32 %v1548_v31, 0.0 }
 0x2ed   : > { %v4511_v35 = vpop.f32.mrf.mxu1 }
 0x2ee   : > { %v1549_v38 = vadd.f32 %v4325_v10, %v4511_v35 }
 0x2ef   : > { %v4515_v46 = vpop.f32.mrf.mxu1 }
 0x2f0   : > { %5135 = vst [vmem:[#allocation25_spill] sm:$0xff] %v4515_v46  ;;  %v1581_v55 = vmax.f32 %v1549_v38, 0.0 }
 0x2f1   : > { %v4517_v58 = vpop.f32.mrf.mxu1 }
 0x2f2   : > { %v1600_v0 = vpack.c.bf16 %v1581_v55, %v1580_v51  ;;  %v1550_v25 = vadd.f32 %v4325_v10, %v4517_v58 }
 0x2f3   : > { %v4519_v7 = vpop.f32.mrf.mxu1 }
 0x2f4   : > { %5136 = vst [vmem:[#allocation26_spill] sm:$0xff] %v4519_v7  ;;  %3716 = vmatprep.mubr.msk.bf16.mxu0 %vm1275_vm3, %v1600_v0  ;;  %v1582_v3 = vmax.f32 %v1550_v25, 0.0 }
 0x2f5   : > { %v4524_v22 = vpop.f32.mrf.mxu1 }
 0x2f6   : > { %v1551_v15 = vadd.f32 %v4325_v10, %v4524_v22 }
 0x2f7   : > { %v4528_v30 = vpop.f32.mrf.mxu1 }
 0x2f8   : > { %5137 = vst [vmem:[#allocation27_spill] sm:$0xff] %v4528_v30  ;;  %v1583_v31 = vmax.f32 %v1551_v15, 0.0 }
 0x2f9   : > { %v4530_v38 = vpop.f32.mrf.mxu1 }
 0x2fa   : > { %v1601_v46 = vpack.c.bf16 %v1583_v31, %v1582_v3  ;;  %v1552_v55 = vadd.f32 %v4325_v10, %v4530_v38 }
 0x2fb   : > { %v4532_v51 = vpop.f32.mrf.mxu1 }
 0x2fc   : > { %5138 = vst [vmem:[#allocation28_spill] sm:$0xff] %v4532_v51  ;;  %3717 = vmatmul.mubr.msk.bf16.gmra.mxu0 %vm1275_vm3, %v1601_v46  ;;  %v1584_v30 = vmax.f32 %v1552_v55, 0.0 }
 0x2fd   : > { %v4537_v0 = vpop.f32.mrf.mxu1 }
 0x2fe   : > { %v1553_v7 = vadd.f32 %v4325_v10, %v4537_v0 }
 0x2ff   : > { %v4541_v5 = vpop.f32.mrf.mxu1 }
 0x300   : > { %5139 = vst [vmem:[#allocation29_spill] sm:$0xff] %v4541_v5  ;;  %v1585_v25 = vmax.f32 %v1553_v7, 0.0  ;;  %v5141_v7 = vmov 0  }
 0x301   : > { %v4543_v15 = vpop.f32.mrf.mxu1 }
 0x302   : > { %v1602_v47 = vpack.c.bf16 %v1585_v25, %v1584_v30  ;;  %v1554_v31 = vadd.f32 %v4325_v10, %v4543_v15  ;;  %v4559_v25 = vld [vmem:[%s5095_s9] ss:$0 sm:$0xff] }
 0x303   : > { %v4545_v3 = vpop.f32.mrf.mxu1 }
 0x304   : > { %5140 = vst [vmem:[#allocation30_spill] sm:$0xff] %v4545_v3  ;;  %3720 = vmatprep.mubr.msk.bf16.mxu0 %vm1275_vm3, %v1602_v47  ;;  %v1586_v60 = vmax.f32 %v1554_v31, 0.0 }
 0x305   : > { %v4550_v46 = vpop.f32.mrf.mxu1 }
 0x306   : > { %v1555_v51 = vadd.f32 %v4325_v10, %v4550_v46 }
 0x308   : > { %v1587_v27 = vmax.f32 %v1555_v51, 0.0 }
 0x30a   : > { %v1603_v5 = vpack.c.bf16 %v1587_v27, %v1586_v60 }
 0x30c   : > { %3721 = vmatmul.mubr.msk.bf16.gmra.mxu0 %vm1275_vm3, %v1603_v5 }
 0x30d   : > { %2028 = vmatprep.mubr.bf16.mxu0 %v5141_v7 }
 0x35c   : > { %v3694_v30 = vpop.f32.mrf.mxu0 }
 0x35d   : > { %v1734_v27 = vadd.f32 %v3694_v30, %v4559_v25 }
 0x35e   : > { %v1725_v55 = vpop.f32.mrf.mxu0 }
 0x35f   : > { %v1726_v3 = vadd.f32 %v4559_v25, %v1725_v55  ;;  %v1854_v44 = vmax.f32 %v1734_v27, 0.0 }
 0x360   : > { %v3695_v47 = vpop.f32.mrf.mxu0 }
 0x361   : > { %v1852_v31 = vmax.f32 %v1726_v3, 0.0  ;;  %v1737_v60 = vadd.f32 %v3695_v47, %v4559_v25 }
 0x362   : > { %v1728_v37 = vpop.f32.mrf.mxu0 }
 0x363   : > { %v1729_v10 = vadd.f32 %v4559_v25, %v1728_v37  ;;  %v1855_v53 = vmax.f32 %v1737_v60, 0.0 }
 0x365   : > { %v1853_v51 = vmax.f32 %v1729_v10, 0.0  ;;  %v1885_v20 = vpack.c.bf16 %v1855_v53, %v1854_v44 }
 0x367   : > { %v1884_v5 = vpack.c.bf16 %v1853_v51, %v1852_v31 }
 0x369   : > { %3426 = vmatmul.mubr.msk.bf16.vlgmr.msra.gmra.mxu0 %vm1275_vm3, %v1884_v5 }
 0x36a   : > { %2038 = vmatprep.mubr.bf16.mxu0 %v5141_v7 }
 0x36c   : > { %v3698_v28 = vpop.f32.mrf.mxu0 }
 0x36d   : > { %v1750_v51 = vadd.f32 %v3698_v28, %v4559_v25 }
 0x36e   : > { %v1741_v4 = vpop.f32.mrf.mxu0 }
 0x36f   : > { %v1742_v63 = vadd.f32 %v4559_v25, %v1741_v4  ;;  %v1858_v53 = vmax.f32 %v1750_v51, 0.0 }
 0x370   : > { %v3699_v55 = vpop.f32.mrf.mxu0 }
 0x371   : > { %3427 = vmatmul.mubr.msk.bf16.gmra.mxu0 %vm1275_vm3, %v1885_v20  ;;  %v1856_v30 = vmax.f32 %v1742_v63, 0.0  ;;  %v1753_v10 = vadd.f32 %v3699_v55, %v4559_v25 }
 0x372   : > { %v1744_v37 = vpop.f32.mrf.mxu0  ;;  %2048 = vmatprep.mubr.bf16.mxu0 %v5141_v7 }
 0x373   : > { %v1745_v3 = vadd.f32 %v4559_v25, %v1744_v37  ;;  %v1859_v44 = vmax.f32 %v1753_v10, 0.0 }
 0x375   : > { %v1857_v47 = vmax.f32 %v1745_v3, 0.0  ;;  %v1887_v60 = vpack.c.bf16 %v1859_v44, %v1858_v53 }
 0x377   : > { %v1886_v31 = vpack.c.bf16 %v1857_v47, %v1856_v30 }
 0x379   : > { %3428 = vmatmul.mubr.msk.bf16.gmra.mxu0 %vm1275_vm3, %v1886_v31 }
 0x37a   : > { %2058 = vmatprep.mubr.bf16.mxu0 %v5141_v7 }
 0x37c   : > { %v3702_v4 = vpop.f32.mrf.mxu0 }
 0x37d   : > { %v1766_v47 = vadd.f32 %v3702_v4, %v4559_v25 }
 0x37e   : > { %v1757_v20 = vpop.f32.mrf.mxu0 }
 0x37f   : > { %v1758_v27 = vadd.f32 %v4559_v25, %v1757_v20  ;;  %v1862_v51 = vmax.f32 %v1766_v47, 0.0 }
 0x380   : > { %v3703_v5 = vpop.f32.mrf.mxu0 }
 0x381   : > { %3429 = vmatmul.mubr.msk.bf16.gmra.mxu0 %vm1275_vm3, %v1887_v60  ;;  %v1860_v28 = vmax.f32 %v1758_v27, 0.0  ;;  %v1769_v3 = vadd.f32 %v3703_v5, %v4559_v25 }
 0x382   : > { %v1760_v63 = vpop.f32.mrf.mxu0  ;;  %2068 = vmatprep.mubr.bf16.mxu0 %v5141_v7 }
 0x383   : > { %v1761_v55 = vadd.f32 %v4559_v25, %v1760_v63  ;;  %v1863_v10 = vmax.f32 %v1769_v3, 0.0 }
 0x385   : > { %v1861_v37 = vmax.f32 %v1761_v55, 0.0  ;;  %v1889_v53 = vpack.c.bf16 %v1863_v10, %v1862_v51 }
 0x387   : > { %v1888_v30 = vpack.c.bf16 %v1861_v37, %v1860_v28 }
 0x389   : > { %3430 = vmatmul.mubr.msk.bf16.gmra.mxu0 %vm1275_vm3, %v1888_v30 }
 0x38a   : > { %2078 = vmatprep.mubr.bf16.mxu0 %v5141_v7 }
 0x38c   : > { %v3706_v31 = vpop.f32.mrf.mxu0 }
 0x38d   : > { %v1782_v37 = vadd.f32 %v3706_v31, %v4559_v25 }
 0x38e   : > { %v1773_v44 = vpop.f32.mrf.mxu0 }
 0x38f   : > { %v1774_v60 = vadd.f32 %v4559_v25, %v1773_v44  ;;  %v1866_v47 = vmax.f32 %v1782_v37, 0.0 }
 0x390   : > { %v3707_v20 = vpop.f32.mrf.mxu0 }
 0x391   : > { %3431 = vmatmul.mubr.msk.bf16.gmra.mxu0 %vm1275_vm3, %v1889_v53  ;;  %v1864_v4 = vmax.f32 %v1774_v60, 0.0  ;;  %v1785_v55 = vadd.f32 %v3707_v20, %v4559_v25 }
 0x392   : > { %v1776_v27 = vpop.f32.mrf.mxu0  ;;  %2088 = vmatprep.mubr.bf16.mxu0 %v5141_v7 }
 0x393   : > { %v1777_v5 = vadd.f32 %v4559_v25, %v1776_v27  ;;  %v1867_v3 = vmax.f32 %v1785_v55, 0.0 }
 0x395   : > { %v1865_v63 = vmax.f32 %v1777_v5, 0.0  ;;  %v1891_v51 = vpack.c.bf16 %v1867_v3, %v1866_v47 }
 0x397   : > { %v1890_v28 = vpack.c.bf16 %v1865_v63, %v1864_v4 }
 0x399   : > { %3432 = vmatmul.mubr.msk.bf16.gmra.mxu0 %vm1275_vm3, %v1890_v28 }
 0x39a   : > { %2098 = vmatprep.mubr.bf16.mxu0 %v5141_v7 }
 0x39c   : > { %v3710_v30 = vpop.f32.mrf.mxu0 }
 0x39d   : > { %v1798_v63 = vadd.f32 %v3710_v30, %v4559_v25 }
 0x39e   : > { %v1789_v10 = vpop.f32.mrf.mxu0 }
 0x39f   : > { %v1790_v53 = vadd.f32 %v4559_v25, %v1789_v10  ;;  %v1870_v37 = vmax.f32 %v1798_v63, 0.0 }
 0x3a0   : > { %v3711_v44 = vpop.f32.mrf.mxu0 }
 0x3a1   : > { %3433 = vmatmul.mubr.msk.bf16.gmra.mxu0 %vm1275_vm3, %v1891_v51  ;;  %v1868_v31 = vmax.f32 %v1790_v53, 0.0  ;;  %v1801_v5 = vadd.f32 %v3711_v44, %v4559_v25 }
 0x3a2   : > { %v1792_v60 = vpop.f32.mrf.mxu0  ;;  %2108 = vmatprep.mubr.bf16.mxu0 %v5141_v7 }
 0x3a3   : > { %v1793_v20 = vadd.f32 %v4559_v25, %v1792_v60  ;;  %v1871_v55 = vmax.f32 %v1801_v5, 0.0 }
 0x3a5   : > { %v1869_v27 = vmax.f32 %v1793_v20, 0.0  ;;  %v1893_v47 = vpack.c.bf16 %v1871_v55, %v1870_v37 }
 0x3a7   : > { %v1892_v4 = vpack.c.bf16 %v1869_v27, %v1868_v31 }
 0x3a9   : > { %3434 = vmatmul.mubr.msk.bf16.gmra.mxu0 %vm1275_vm3, %v1892_v4 }
 0x3aa   : > { %2118 = vmatprep.mubr.bf16.mxu0 %v5141_v7 }
 0x3ac   : > { %v3714_v28 = vpop.f32.mrf.mxu0 }
 0x3ad   : > { %v1814_v27 = vadd.f32 %v3714_v28, %v4559_v25 }
 0x3ae   : > { %v1805_v3 = vpop.f32.mrf.mxu0 }
 0x3af   : > { %v1806_v51 = vadd.f32 %v4559_v25, %v1805_v3  ;;  %v1874_v63 = vmax.f32 %v1814_v27, 0.0 }
 0x3b0   : > { %v3715_v10 = vpop.f32.mrf.mxu0 }
 0x3b1   : > { %3435 = vmatmul.mubr.msk.bf16.gmra.mxu0 %vm1275_vm3, %v1893_v47  ;;  %v1872_v30 = vmax.f32 %v1806_v51, 0.0  ;;  %v1817_v20 = vadd.f32 %v3715_v10, %v4559_v25 }
 0x3b2   : > { %v1808_v53 = vpop.f32.mrf.mxu0  ;;  %2128 = vmatprep.mubr.bf16.mxu0 %v5141_v7 }
 0x3b3   : > { %v1809_v44 = vadd.f32 %v4559_v25, %v1808_v53  ;;  %v1875_v5 = vmax.f32 %v1817_v20, 0.0 }
 0x3b5   : > { %v1873_v60 = vmax.f32 %v1809_v44, 0.0  ;;  %v1895_v37 = vpack.c.bf16 %v1875_v5, %v1874_v63 }
 0x3b7   : > { %v1894_v31 = vpack.c.bf16 %v1873_v60, %v1872_v30 }
 0x3b9   : > { %3436 = vmatmul.mubr.msk.bf16.gmra.mxu0 %vm1275_vm3, %v1894_v31 }
 0x3ba   : > { %2138 = vmatprep.mubr.bf16.mxu0 %v5141_v7 }
 0x3bc   : > { %v3718_v4 = vpop.f32.mrf.mxu0 }
 0x3bd   : > { %v1830_v60 = vadd.f32 %v3718_v4, %v4559_v25 }
 0x3be   : > { %v1821_v55 = vpop.f32.mrf.mxu0 }
 0x3bf   : > { %v1822_v47 = vadd.f32 %v4559_v25, %v1821_v55  ;;  %v1878_v27 = vmax.f32 %v1830_v60, 0.0 }
 0x3c0   : > { %v3719_v3 = vpop.f32.mrf.mxu0 }
 0x3c1   : > { %3437 = vmatmul.mubr.msk.bf16.gmra.mxu0 %vm1275_vm3, %v1895_v37  ;;  %v1876_v28 = vmax.f32 %v1822_v47, 0.0  ;;  %v1833_v44 = vadd.f32 %v3719_v3, %v4559_v25 }
 0x3c2   : > { %v1824_v51 = vpop.f32.mrf.mxu0  ;;  %2148 = vmatprep.mubr.bf16.mxu0 %v5141_v7 }
 0x3c3   : > { %v1825_v10 = vadd.f32 %v4559_v25, %v1824_v51  ;;  %v1879_v20 = vmax.f32 %v1833_v44, 0.0 }
 0x3c5   : > { %v1877_v53 = vmax.f32 %v1825_v10, 0.0  ;;  %v1897_v63 = vpack.c.bf16 %v1879_v20, %v1878_v27 }
 0x3c7   : > { %v1896_v30 = vpack.c.bf16 %v1877_v53, %v1876_v28 }
 0x3c9   : > { %3438 = vmatmul.mubr.msk.bf16.gmra.mxu0 %vm1275_vm3, %v1896_v30 }
 0x3ca   : > { %2158 = vmatprep.mubr.bf16.mxu0 %v5141_v7 }
 0x3cc   : > { %v3722_v31 = vpop.f32.mrf.mxu0 }
 0x3cd   : > { %v1846_v53 = vadd.f32 %v3722_v31, %v4559_v25 }
 0x3ce   : > { %v1837_v5 = vpop.f32.mrf.mxu0 }
 0x3cf   : > { %v1838_v37 = vadd.f32 %v4559_v25, %v1837_v5  ;;  %v1882_v30 = vmax.f32 %v1846_v53, 0.0 }
 0x3d0   : > { %v3723_v55 = vpop.f32.mrf.mxu0 }
 0x3d1   : > { %3439 = vmatmul.mubr.msk.bf16.gmra.mxu0 %vm1275_vm3, %v1897_v63  ;;  %v1880_v4 = vmax.f32 %v1838_v37, 0.0  ;;  %v1849_v10 = vadd.f32 %v3723_v55, %v4559_v25 }
 0x3d2   : > { %v1840_v47 = vpop.f32.mrf.mxu0  ;;  %2168 = vmatprep.mubr.bf16.mxu0 %v5141_v7 }
 0x3d3   : > { %v1841_v3 = vadd.f32 %v4559_v25, %v1840_v47  ;;  %v1883_v44 = vmax.f32 %v1849_v10, 0.0 }
 0x3d5   : > { %v1881_v51 = vmax.f32 %v1841_v3, 0.0  ;;  %v1899_v60 = vpack.c.bf16 %v1883_v44, %v1882_v30 }
 0x3d7   : > { %v1898_v28 = vpack.c.bf16 %v1881_v51, %v1880_v4 }
 0x3d9   : > { %3440 = vmatmul.mubr.msk.bf16.gmra.mxu0 %vm1275_vm3, %v1898_v28 }
 0x3da   : > { %2178 = vmatprep.mubr.bf16.mxu0 %v5141_v7  ;;  %v3442_v7 = vld [vmem:[%s5097_s11] ss:$0 sm:$0xff] }
 0x3e1   : > { %3441 = vmatmul.mubr.msk.bf16.gmra.mxu0 %vm1275_vm3, %v1899_v60 }
 0x429   : > { %v4624_v20 = vpop.f32.mrf.mxu0 }
 0x42b   : > { %v2032_v27 = vpop.f32.mrf.mxu0 }
 0x42c   : > { %2221 = vrot.lane.b32.xlu0 %v2032_v27, %s3972_s26 }
 0x42d   : > { %v4627_v5 = vpop.f32.mrf.mxu0 }
 0x42f   : > { %v2036_v63 = vpop.f32.mrf.mxu0 }
 0x430   : > { %2223 = vrot.lane.b32.xlu0 %v2036_v63, %s3972_s26 }
 0x431   : > { %v4630_v25 = vpop.f32.mrf.mxu0 }
 0x433   : > { %v2042_v31 = vpop.f32.mrf.mxu0 }
 0x434   : > { %2355 = vrot.lane.b32.xlu0 %v3442_v7, %s3972_s26  ;;  %2225 = vrot.lane.b32.xlu1 %v2042_v31, %s3972_s26 }
 0x435   : > { %v4637_v55 = vpop.f32.mrf.mxu0 }
 0x437   : > { %v2046_v37 = vpop.f32.mrf.mxu0 }
 0x438   : > { %2227 = vrot.lane.b32.xlu1 %v2046_v37, %s3972_s26 }
 0x439   : > { %v4640_v47 = vpop.f32.mrf.mxu0 }
 0x43b   : > { %v2052_v3 = vpop.f32.mrf.mxu0 }
 0x43c   : > { %2229 = vrot.lane.b32.xlu1 %v2052_v3, %s3972_s26 }
 0x43d   : > { %v4643_v4 = vpop.f32.mrf.mxu0 }
 0x43f   : > { %v2056_v51 = vpop.f32.mrf.mxu0 }
 0x440   : > { %2231 = vrot.lane.b32.xlu0 %v2056_v51, %s3972_s26 }
 0x441   : > { %v4646_v10 = vpop.f32.mrf.mxu0 }
 0x443   : > { %v2062_v28 = vpop.f32.mrf.mxu0 }
 0x444   : > { %2233 = vrot.lane.b32.xlu1 %v2062_v28, %s3972_s26 }
 0x445   : > { %v4649_v53 = vpop.f32.mrf.mxu0 }
 0x447   : > { %v2066_v44 = vpop.f32.mrf.mxu0 }
 0x448   : > { %2235 = vrot.lane.b32.xlu0 %v2066_v44, %s3972_s26 }
 0x449   : > { %v4652_v30 = vpop.f32.mrf.mxu0 }
 0x44a   : > { %5142 = vst [vmem:[#allocation31_spill] sm:$0xff] %v4652_v30 }
 0x44b   : > { %v2072_v60 = vpop.f32.mrf.mxu0 }
 0x44c   : > { %2237 = vrot.lane.b32.xlu1 %v2072_v60, %s3972_s26 }
 0x44d   : > { %v4655_v27 = vpop.f32.mrf.mxu0 }
 0x44e   : > { %5143 = vst [vmem:[#allocation32_spill] sm:$0xff] %v4655_v27 }
 0x44f   : > { %v2076_v63 = vpop.f32.mrf.mxu0 }
 0x450   : > { %2239 = vrot.lane.b32.xlu0 %v2076_v63, %s3972_s26 }
 0x451   : > { %v4658_v7 = vpop.f32.mrf.mxu0 }
 0x452   : > { %5144 = vst [vmem:[#allocation33_spill] sm:$0xff] %v4658_v7 }
 0x453   : > { %v2082_v31 = vpop.f32.mrf.mxu0 }
 0x454   : > { %2241 = vrot.lane.b32.xlu1 %v2082_v31, %s3972_s26 }
 0x455   : > { %v4661_v37 = vpop.f32.mrf.mxu0 }
 0x456   : > { %5145 = vst [vmem:[#allocation34_spill] sm:$0xff] %v4661_v37 }
 0x457   : > { %v2086_v3 = vpop.f32.mrf.mxu0 }
 0x458   : > { %2243 = vrot.lane.b32.xlu0 %v2086_v3, %s3972_s26 }
 0x459   : > { %v4664_v51 = vpop.f32.mrf.mxu0 }
 0x45a   : > { %5146 = vst [vmem:[#allocation35_spill] sm:$0xff] %v4664_v51 }
 0x45b   : > { %v2092_v28 = vpop.f32.mrf.mxu0 }
 0x45c   : > { %2245 = vrot.lane.b32.xlu1 %v2092_v28, %s3972_s26 }
 0x45d   : > { %v4667_v44 = vpop.f32.mrf.mxu0 }
 0x45e   : > { %5147 = vst [vmem:[#allocation36_spill] sm:$0xff] %v4667_v44 }
 0x45f   : > { %v2096_v60 = vpop.f32.mrf.mxu0 }
 0x460   : > { %2247 = vrot.lane.b32.xlu0 %v2096_v60, %s3972_s26 }
 0x461   : > { %v4670_v63 = vpop.f32.mrf.mxu0 }
 0x462   : > { %5148 = vst [vmem:[#allocation37_spill] sm:$0xff] %v4670_v63 }
 0x463   : > { %v2102_v11 = vpop.f32.mrf.mxu0 }
 0x464   : > { %2249 = vrot.lane.b32.xlu1 %v2102_v11, %s3972_s26 }
 0x465   : > { %v4673_v31 = vpop.f32.mrf.mxu0 }
 0x466   : > { %5149 = vst [vmem:[#allocation38_spill] sm:$0xff] %v4673_v31 }
 0x467   : > { %v2106_v27 = vpop.f32.mrf.mxu0 }
 0x468   : > { %2251 = vrot.lane.b32.xlu0 %v2106_v27, %s3972_s26 }
 0x469   : > { %v4676_v3 = vpop.f32.mrf.mxu0 }
 0x46a   : > { %5150 = vst [vmem:[#allocation39_spill] sm:$0xff] %v4676_v3 }
 0x46b   : > { %v2112_v51 = vpop.f32.mrf.mxu0 }
 0x46c   : > { %2253 = vrot.lane.b32.xlu1 %v2112_v51, %s3972_s26 }
 0x46d   : > { %v4679_v28 = vpop.f32.mrf.mxu0 }
 0x46e   : > { %5151 = vst [vmem:[#allocation40_spill] sm:$0xff] %v4679_v28 }
 0x46f   : > { %v2116_v44 = vpop.f32.mrf.mxu0 }
 0x470   : > { %2255 = vrot.lane.b32.xlu0 %v2116_v44, %s3972_s26 }
 0x471   : > { %v4682_v60 = vpop.f32.mrf.mxu0 }
 0x472   : > { %5152 = vst [vmem:[#allocation41_spill] sm:$0xff] %v4682_v60 }
 0x473   : > { %v2122_v63 = vpop.f32.mrf.mxu0 }
 0x474   : > { %2257 = vrot.lane.b32.xlu1 %v2122_v63, %s3972_s26 }
 0x475   : > { %v4685_v11 = vpop.f32.mrf.mxu0 }
 0x476   : > { %5153 = vst [vmem:[#allocation42_spill] sm:$0xff] %v4685_v11 }
 0x477   : > { %v2126_v31 = vpop.f32.mrf.mxu0 }
 0x478   : > { %2259 = vrot.lane.b32.xlu0 %v2126_v31, %s3972_s26 }
 0x479   : > { %v4688_v27 = vpop.f32.mrf.mxu0 }
 0x47a   : > { %5154 = vst [vmem:[#allocation43_spill] sm:$0xff] %v4688_v27 }
 0x47b   : > { %v2132_v3 = vpop.f32.mrf.mxu0 }
 0x47c   : > { %2261 = vrot.lane.b32.xlu1 %v2132_v3, %s3972_s26 }
 0x47d   : > { %v4691_v51 = vpop.f32.mrf.mxu0 }
 0x47e   : > { %5155 = vst [vmem:[#allocation44_spill] sm:$0xff] %v4691_v51 }
 0x47f   : > { %v2136_v28 = vpop.f32.mrf.mxu0 }
 0x480   : > { %2263 = vrot.lane.b32.xlu0 %v2136_v28, %s3972_s26 }
 0x481   : > { %v4694_v44 = vpop.f32.mrf.mxu0 }
 0x482   : > { %5156 = vst [vmem:[#allocation45_spill] sm:$0xff] %v4694_v44 }
 0x483   : > { %v2142_v60 = vpop.f32.mrf.mxu0 }
 0x484   : > { %2265 = vrot.lane.b32.xlu1 %v2142_v60, %s3972_s26  ;;  %v3899_v60 = vld [vmem:[%s5098_s12 + $0x18] sm:$0xff]  }
 0x485   : > { %v4697_v63 = vpop.f32.mrf.mxu0  ;;  %3724 = vmatprep.subr.bf16.mxu1 %v3899_v60 }
 0x486   : > { %5157 = vst [vmem:[#allocation46_spill] sm:$0xff] %v4697_v63  ;;  %3725 = vmatpush3.bf16.msra.mxu1 %v3899_v60 }
 0x487   : > { %v2146_v11 = vpop.f32.mrf.mxu0 }
 0x488   : > { %2267 = vrot.lane.b32.xlu0 %v2146_v11, %s3972_s26 }
 0x489   : > { %v4700_v31 = vpop.f32.mrf.mxu0 }
 0x48a   : > { %5158 = vst [vmem:[#allocation47_spill] sm:$0xff] %v4700_v31 }
 0x48b   : > { %v2152_v27 = vpop.f32.mrf.mxu0 }
 0x48c   : > { %2269 = vrot.lane.b32.xlu1 %v2152_v27, %s3972_s26  ;;  %v3900_v27 = vld [vmem:[%s5098_s12 + $0x10] sm:$0xff]  }
 0x48d   : > { %v4703_v3 = vpop.f32.mrf.mxu0  ;;  %3726 = vmatprep.subr.bf16.mxu1 %v3900_v27 }
 0x48e   : > { %5159 = vst [vmem:[#allocation48_spill] sm:$0xff] %v4703_v3  ;;  %3727 = vmatpush3.bf16.msra.mxu1 %v3900_v27 }
 0x48f   : > { %v2156_v51 = vpop.f32.mrf.mxu0 }
 0x490   : > { %2271 = vrot.lane.b32.xlu0 %v2156_v51, %s3972_s26 }
 0x491   : > { %v4706_v28 = vpop.f32.mrf.mxu0 }
 0x492   : > { %5160 = vst [vmem:[#allocation49_spill] sm:$0xff] %v4706_v28 }
 0x493   : > { %v2162_v44 = vpop.f32.mrf.mxu0 }
 0x494   : > { %2273 = vrot.lane.b32.xlu1 %v2162_v44, %s3972_s26  ;;  %v3901_v44 = vld [vmem:[%s5098_s12 + $0x8] sm:$0xff]  }
 0x495   : > { %v4712_v11 = vpop.f32.mrf.mxu0  ;;  %3728 = vmatprep.subr.bf16.mxu1 %v3901_v44 }
 0x496   : > { %5161 = vst [vmem:[#allocation50_spill] sm:$0xff] %v4712_v11  ;;  %3729 = vmatpush3.bf16.msra.mxu1 %v3901_v44 }
 0x497   : > { %v2166_v31 = vpop.f32.mrf.mxu0 }
 0x498   : > { %2275 = vrot.lane.b32.xlu0 %v2166_v31, %s3972_s26 }
 0x499   : > { %v4718_v51 = vpop.f32.mrf.mxu0 }
 0x49a   : > { %5162 = vst [vmem:[#allocation51_spill] sm:$0xff] %v4718_v51  ;;  %v3902_v51 = vld [vmem:[%s5098_s12] sm:$0xff]  }
 0x49b   : > { %v2172_v3 = vpop.f32.mrf.mxu0  ;;  %3730 = vmatprep.subr.bf16.mxu1 %v3902_v51 }
 0x49c   : > { %2277 = vrot.lane.b32.xlu1 %v2172_v3, %s3972_s26  ;;  %3731 = vmatpush3.bf16.msra.mxu1 %v3902_v51 }
 0x49d   : > { %v4724_v11 = vpop.f32.mrf.mxu0 }
 0x49e   : > { %5163 = vst [vmem:[#allocation52_spill] sm:$0xff] %v4724_v11  ;;  %v2222_v60 = vpop.permute.xlu0 %2221 }
 0x49f   : > { %v2176_v31 = vpop.f32.mrf.mxu0  ;;  %v2317_v11 = vadd.f32 %v2222_v60, %v4320_v9 }
 0x4a0   : > { %2279 = vrot.lane.b32.xlu0 %v2176_v31, %s3972_s26 }
 0x4a1   : > { %v4730_v28 = vpop.f32.mrf.mxu0 }
 0x4a2   : > { %5164 = vst [vmem:[#allocation53_spill] sm:$0xff] %v4730_v28  ;;  %v2224_v27 = vpop.permute.xlu0 %2223 }
 0x4a3   : > { %v2182_v3 = vpop.f32.mrf.mxu0  ;;  %v2318_v63 = vadd.f32 %v2224_v27, %v4334_v12 }
 0x4a4   : > { %2281 = vrot.lane.b32.xlu1 %v2182_v3, %s3972_s26 }
 0x4a5   : > { %v4735_v50 = vpop.f32.mrf.mxu0 }
 0x4a6   : > { %5165 = vst [vmem:[#allocation54_spill] sm:$0xff] %v4735_v50  ;;  %v4737_v44 = vpop.permute.xlu0 %2355  ;;  %v2226_v31 = vpop.permute.xlu1 %2225 }
 0x4a7   : > { %v2319_v37 = vadd.f32 %v2226_v31, %v4340_v19  ;;  %v2186_v59 = vpop.f32.mrf.mxu0  ;;  %v2358_v28 = vadd.f32 %v4737_v44, %v2317_v11  ;;  %v2359_v30 = vadd.f32 %v4737_v44, %v2318_v63 }
 0x4a8   : > { %2283 = vrot.lane.b32.xlu0 %v2186_v59, %s3972_s26 }
 0x4a9   : > { %v2390_v51 = vmax.f32 %v2358_v28, 0.0  ;;  %v2391_v3 = vmax.f32 %v2359_v30, 0.0  ;;  %v2360_v9 = vadd.f32 %v4737_v44, %v2319_v37 }
 0x4aa   : > { %v2228_v45 = vpop.permute.xlu1 %2227 }
 0x4ab   : > { %v2320_v12 = vadd.f32 %v2228_v45, %v4347_v23  ;;  %v2422_v60 = vpack.c.bf16 %v2391_v3, %v2390_v51  ;;  %v2392_v31 = vmax.f32 %v2360_v9, 0.0 }
 0x4ad   : > { %v2361_v27 = vadd.f32 %v4737_v44, %v2320_v12  ;;  %2469 = vrot.lane.b32.xlu1 %v2422_v60, %s3972_s26 }
 0x4ae   : > { %v2230_v19 = vpop.permute.xlu1 %2229 }
 0x4af   : > { %v2393_v50 = vmax.f32 %v2361_v27, 0.0  ;;  %v2321_v11 = vadd.f32 %v2230_v19, %v4353_v29 }
 0x4b1   : > { %v2423_v63 = vpack.c.bf16 %v2393_v50, %v2392_v31  ;;  %v2362_v59 = vadd.f32 %v4737_v44, %v2321_v11 }
 0x4b2   : > { %v2232_v7 = vpop.permute.xlu0 %2231 }
 0x4b3   : > { %v2322_v30 = vadd.f32 %v2232_v7, %v4363_v34  ;;  %2471 = vrot.lane.b32.xlu0 %v2423_v63, %s3972_s26  ;;  %v2394_v37 = vmax.f32 %v2362_v59, 0.0 }
 0x4b5   : > { %v2363_v23 = vadd.f32 %v4737_v44, %v2322_v30 }
 0x4b6   : > { %v2234_v45 = vpop.permute.xlu1 %2233 }
 0x4b7   : > { %v2395_v28 = vmax.f32 %v2363_v23, 0.0  ;;  %v2323_v51 = vadd.f32 %v2234_v45, %v4369_v39 }
 0x4b9   : > { %v2424_v3 = vpack.c.bf16 %v2395_v28, %v2394_v37  ;;  %v2364_v12 = vadd.f32 %v4737_v44, %v2323_v51 }
 0x4ba   : > { %v2236_v9 = vpop.permute.xlu0 %2235 }
 0x4bb   : > { %v2324_v29 = vadd.f32 %v2236_v9, %v4376_v43  ;;  %2473 = vrot.lane.b32.xlu1 %v2424_v3, %s3972_s26  ;;  %v2396_v7 = vmax.f32 %v2364_v12, 0.0 }
 0x4bd   : > { %v2365_v50 = vadd.f32 %v4737_v44, %v2324_v29 }
 0x4be   : > { %v2238_v34 = vpop.permute.xlu1 %2237 }
 0x4bf   : > { %v2397_v60 = vmax.f32 %v2365_v50, 0.0  ;;  %v2325_v27 = vadd.f32 %v2238_v34, %v4382_v48 }
 0x4c1   : > { %v2425_v19 = vpack.c.bf16 %v2397_v60, %v2396_v7  ;;  %v2366_v11 = vadd.f32 %v4737_v44, %v2325_v27 }
 0x4c2   : > { %v2240_v31 = vpop.permute.xlu0 %2239 }
 0x4c3   : > { %v2326_v39 = vadd.f32 %v2240_v31, %v4389_v52  ;;  %2475 = vrot.lane.b32.xlu0 %v2425_v19, %s3972_s26  ;;  %v2398_v59 = vmax.f32 %v2366_v11, 0.0 }
 0x4c5   : > { %v2367_v63 = vadd.f32 %v4737_v44, %v2326_v39 }
 0x4c6   : > { %v2242_v43 = vpop.permute.xlu1 %2241 }
 0x4c7   : > { %v2399_v30 = vmax.f32 %v2367_v63, 0.0  ;;  %v2327_v23 = vadd.f32 %v2242_v43, %v4395_v57 }
 0x4c9   : > { %v2426_v45 = vpack.c.bf16 %v2399_v30, %v2398_v59  ;;  %v2368_v28 = vadd.f32 %v4737_v44, %v2327_v23 }
 0x4ca   : > { %v2244_v37 = vpop.permute.xlu0 %2243 }
 0x4cb   : > { %v2328_v48 = vadd.f32 %v2244_v37, %v4402_v61  ;;  %2477 = vrot.lane.b32.xlu1 %v2426_v45, %s3972_s26  ;;  %v2400_v3 = vmax.f32 %v2368_v28, 0.0 }
 0x4cd   : > { %v2369_v51 = vadd.f32 %v4737_v44, %v2328_v48 }
 0x4ce   : > { %v2246_v52 = vpop.permute.xlu1 %2245 }
 0x4cf   : > { %v2401_v9 = vmax.f32 %v2369_v51, 0.0  ;;  %v2329_v12 = vadd.f32 %v2246_v52, %v4408_v2 }
 0x4d1   : > { %v2427_v29 = vpack.c.bf16 %v2401_v9, %v2400_v3  ;;  %v2370_v34 = vadd.f32 %v4737_v44, %v2329_v12 }
 0x4d2   : > { %v2248_v50 = vpop.permute.xlu0 %2247 }
 0x4d3   : > { %v2330_v57 = vadd.f32 %v2248_v50, %v4415_v6  ;;  %2479 = vrot.lane.b32.xlu0 %v2427_v29, %s3972_s26  ;;  %v2402_v60 = vmax.f32 %v2370_v34, 0.0 }
 0x4d5   : > { %v2371_v7 = vadd.f32 %v4737_v44, %v2330_v57 }
 0x4d6   : > { %v2250_v61 = vpop.permute.xlu1 %2249 }
 0x4d7   : > { %v2403_v27 = vmax.f32 %v2371_v7, 0.0  ;;  %v2331_v19 = vadd.f32 %v2250_v61, %v4421_v16 }
 0x4d9   : > { %v2428_v31 = vpack.c.bf16 %v2403_v27, %v2402_v60  ;;  %v2372_v39 = vadd.f32 %v4737_v44, %v2331_v19 }
 0x4da   : > { %v2252_v11 = vpop.permute.xlu0 %2251 }
 0x4db   : > { %v2332_v2 = vadd.f32 %v2252_v11, %v4428_v24  ;;  %2481 = vrot.lane.b32.xlu1 %v2428_v31, %s3972_s26  ;;  %v2404_v43 = vmax.f32 %v2372_v39, 0.0 }
 0x4dd   : > { %v2373_v63 = vadd.f32 %v4737_v44, %v2332_v2 }
 0x4de   : > { %v2254_v6 = vpop.permute.xlu1 %2253 }
 0x4df   : > { %v2405_v59 = vmax.f32 %v2373_v63, 0.0  ;;  %v2333_v30 = vadd.f32 %v2254_v6, %v4434_v33 }
 0x4e1   : > { %v2429_v23 = vpack.c.bf16 %v2405_v59, %v2404_v43  ;;  %v2374_v37 = vadd.f32 %v4737_v44, %v2333_v30 }
 0x4e2   : > { %v2256_v45 = vpop.permute.xlu0 %2255 }
 0x4e3   : > { %v2334_v16 = vadd.f32 %v2256_v45, %v4441_v40  ;;  %2483 = vrot.lane.b32.xlu0 %v2429_v23, %s3972_s26  ;;  %v2406_v48 = vmax.f32 %v2374_v37, 0.0 }
 0x4e5   : > { %v2375_v28 = vadd.f32 %v4737_v44, %v2334_v16 }
 0x4e6   : > { %v2258_v24 = vpop.permute.xlu1 %2257 }
 0x4e7   : > { %v2407_v51 = vmax.f32 %v2375_v28, 0.0  ;;  %v2335_v52 = vadd.f32 %v2258_v24, %v4447_v49 }
 0x4e9   : > { %v2430_v3 = vpack.c.bf16 %v2407_v51, %v2406_v48  ;;  %v2376_v12 = vadd.f32 %v4737_v44, %v2335_v52 }
 0x4ea   : > { %v2260_v9 = vpop.permute.xlu0 %2259 }
 0x4eb   : > { %v2336_v33 = vadd.f32 %v2260_v9, %v4454_v56  ;;  %2485 = vrot.lane.b32.xlu1 %v2430_v3, %s3972_s26  ;;  %v2408_v50 = vmax.f32 %v2376_v12, 0.0 }
 0x4ed   : > { %v2377_v29 = vadd.f32 %v4737_v44, %v2336_v33 }
 0x4ee   : > { %v2262_v40 = vpop.permute.xlu1 %2261 }
 0x4ef   : > { %v2409_v34 = vmax.f32 %v2377_v29, 0.0  ;;  %v2337_v57 = vadd.f32 %v2262_v40, %v4460_v1 }
 0x4f1   : > { %v2431_v7 = vpack.c.bf16 %v2409_v34, %v2408_v50  ;;  %v2378_v60 = vadd.f32 %v4737_v44, %v2337_v57 }
 0x4f2   : > { %v2264_v61 = vpop.permute.xlu0 %2263 }
 0x4f3   : > { %v2338_v49 = vadd.f32 %v2264_v61, %v4473_v17  ;;  %2487 = vrot.lane.b32.xlu0 %v2431_v7, %s3972_s26  ;;  %v2410_v19 = vmax.f32 %v2378_v60, 0.0  ;;  %v3903_v7 = vld [vmem:[%s5100_s14 + $0x18] sm:$0xff]  }
 0x4f4   : > { %3764 = vmatprep.subr.bf16.mxu1 %v3903_v7 }
 0x4f5   : > { %v2379_v27 = vadd.f32 %v4737_v44, %v2338_v49 }
 0x4f6   : > { %v2266_v56 = vpop.permute.xlu1 %2265 }
 0x4f7   : > { %v2411_v31 = vmax.f32 %v2379_v27, 0.0  ;;  %v2339_v11 = vadd.f32 %v2266_v56, %v4485_v42 }
 0x4f9   : > { %v2432_v39 = vpack.c.bf16 %v2411_v31, %v2410_v19  ;;  %v2380_v63 = vadd.f32 %v4737_v44, %v2339_v11 }
 0x4fa   : > { %v2268_v2 = vpop.permute.xlu0 %2267 }
 0x4fb   : > { %v2340_v1 = vadd.f32 %v2268_v2, %v4498_v62  ;;  %2489 = vrot.lane.b32.xlu1 %v2432_v39, %s3972_s26  ;;  %v2412_v43 = vmax.f32 %v2380_v63, 0.0 }
 0x4fd   : > { %v2381_v6 = vadd.f32 %v4737_v44, %v2340_v1 }
 0x4fe   : > { %v2270_v17 = vpop.permute.xlu1 %2269 }
 0x4ff   : > { %v2413_v59 = vmax.f32 %v2381_v6, 0.0  ;;  %v2341_v30 = vadd.f32 %v2270_v17, %v4504_v13 }
 0x501   : > { %v2433_v23 = vpack.c.bf16 %v2413_v59, %v2412_v43  ;;  %v2382_v37 = vadd.f32 %v4737_v44, %v2341_v30  ;;  %v3904_v30 = vld [vmem:[%s5100_s14 + $0x10] sm:$0xff]  }
 0x502   : > { %v2272_v45 = vpop.permute.xlu0 %2271 }
 0x503   : > { %v2342_v42 = vadd.f32 %v2272_v45, %v4511_v35  ;;  %2491 = vrot.lane.b32.xlu0 %v2433_v23, %s3972_s26  ;;  %v2414_v28 = vmax.f32 %v2382_v37, 0.0  ;;  %v3905_v23 = vld [vmem:[%s5100_s14 + $0x8] sm:$0xff]   ;;  %v3906_v37 = vld [vmem:[%s5100_s14] sm:$0xff]  }
 0x505   : > { %v2383_v16 = vadd.f32 %v4737_v44, %v2342_v42 }
 0x506   : > { %v2274_v62 = vpop.permute.xlu1 %2273 }
 0x507   : > { %v2415_v24 = vmax.f32 %v2383_v16, 0.0  ;;  %v2343_v48 = vadd.f32 %v2274_v62, %v4517_v58 }
 0x509   : > { %v2434_v51 = vpack.c.bf16 %v2415_v24, %v2414_v28  ;;  %v2384_v3 = vadd.f32 %v4737_v44, %v2343_v48 }
 0x50a   : > { %v2276_v52 = vpop.permute.xlu0 %2275 }
 0x50b   : > { %v2344_v13 = vadd.f32 %v2276_v52, %v4524_v22  ;;  %2493 = vrot.lane.b32.xlu1 %v2434_v51, %s3972_s26  ;;  %v2416_v12 = vmax.f32 %v2384_v3, 0.0  ;;  %v4849_v52 = vld [vmem:[%s5099_s13] ss:$0 sm:$0xff] }
 0x50d   : > { %v2385_v9 = vadd.f32 %v4737_v44, %v2344_v13 }
 0x50e   : > { %v2278_v35 = vpop.permute.xlu1 %2277 }
 0x50f   : > { %v2417_v33 = vmax.f32 %v2385_v9, 0.0  ;;  %v2345_v29 = vadd.f32 %v2278_v35, %v4530_v38 }
 0x511   : > { %v2435_v40 = vpack.c.bf16 %v2417_v33, %v2416_v12  ;;  %v2386_v34 = vadd.f32 %v4737_v44, %v2345_v29 }
 0x512   : > { %v2280_v50 = vpop.permute.xlu0 %2279 }
 0x513   : > { %v2346_v58 = vadd.f32 %v2280_v50, %v4537_v0  ;;  %2495 = vrot.lane.b32.xlu0 %v2435_v40, %s3972_s26  ;;  %v2418_v61 = vmax.f32 %v2386_v34, 0.0 }
 0x515   : > { %v2387_v57 = vadd.f32 %v4737_v44, %v2346_v58 }
 0x516   : > { %v2282_v22 = vpop.permute.xlu1 %2281 }
 0x517   : > { %v2419_v60 = vmax.f32 %v2387_v57, 0.0  ;;  %v2347_v49 = vadd.f32 %v2282_v22, %v4543_v15 }
 0x519   : > { %v2436_v38 = vpack.c.bf16 %v2419_v60, %v2418_v61  ;;  %v2388_v56 = vadd.f32 %v4737_v44, %v2347_v49 }
 0x51a   : > { %v2284_v27 = vpop.permute.xlu0 %2283 }
 0x51b   : > { %v2348_v0 = vadd.f32 %v2284_v27, %v4550_v46  ;;  %2497 = vrot.lane.b32.xlu1 %v2436_v38, %s3972_s26  ;;  %v2420_v31 = vmax.f32 %v2388_v56, 0.0 }
 0x51d   : > { %v2389_v19 = vadd.f32 %v4737_v44, %v2348_v0 }
 0x51f   : > { %v2421_v11 = vmax.f32 %v2389_v19, 0.0  ;;  %v2470_v39 = vpop.permute.xlu1 %2469 }
 0x520   : > { %3732 = vmatprep.mubr.msk.bf16.mxu1 %vm1275_vm3, %v2470_v39 }
 0x521   : > { %v2437_v2 = vpack.c.bf16 %v2421_v11, %v2420_v31 }
 0x523   : > { %2499 = vrot.lane.b32.xlu0 %v2437_v2, %s3972_s26  ;;  %s3315_s26 = sshll.u32 %s4080_s25, 1  ;;  %s3973_s25 = smov [#allocation2]  }
 0x524   : > { %p539_p11 = scmp.lt.s32.totalorder %s3315_s26, 3  ;;  %s3913_s30 = sshll.u32 %s3973_s25, 4  ;;  %s3914_s30 = int_to_ptr.vmem [resolvable:$false] %s3913_s30 }
 0x525   : > { %v2472_v15 = vpop.permute.xlu0 %2471  ;;  %p3916_p1 = scmp.lt.s32.totalorder %s5047_s29, %s3914_s30 }
 0x526   : > { %3733 = vmatmul.mubr.msk.bf16.vlgmr.msra.gmra.mxu1 %vm1275_vm3, %v2472_v15  ;;  %s5222_s26 = smov (!%p539_p11, %s3315_s26), 3 }
 0x527   : > { %3765 = vmatpush3.bf16.msra.mxu1 %v3903_v7  ;;  %s3316_s18 = sshll.u32 %s5222_s26, 2  ;;  %s3915_s26 = scalar_lea.vmem %s3914_s30, 256 }
 0x528   : > { %3766 = vmatprep.subr.bf16.mxu1 %v3904_v30  ;;  %s542_s23 = scalar_lea.vmem %s5166_s1, %s3316_s18 }
 0x52b   : > { %3767 = vmatpush3.bf16.msra.mxu1 %v3904_v30 }
 0x52c   : > { %3768 = vmatprep.subr.bf16.mxu1 %v3905_v23 }
 0x52d   : > { %v2474_v63 = vpop.permute.xlu1 %2473 }
 0x52e   : > { %3736 = vmatprep.mubr.msk.bf16.mxu1 %vm1275_vm3, %v2474_v63 }
 0x52f   : > { %3769 = vmatpush3.bf16.msra.mxu1 %v3905_v23 }
 0x530   : > { %3770 = vmatprep.subr.bf16.mxu1 %v3906_v37 }
 0x533   : > { %3771 = vmatpush3.bf16.msra.mxu1 %v3906_v37 }
 0x535   : > { %v2476_v46 = vpop.permute.xlu0 %2475 }
 0x536   : > { %3737 = vmatmul.mubr.msk.bf16.gmra.mxu1 %vm1275_vm3, %v2476_v46 }
 0x53d   : > { %v2478_v1 = vpop.permute.xlu1 %2477 }
 0x53e   : > { %3740 = vmatprep.mubr.msk.bf16.mxu1 %vm1275_vm3, %v2478_v1 }
 0x545   : > { %v2480_v44 = vpop.permute.xlu0 %2479 }
 0x546   : > { %3741 = vmatmul.mubr.msk.bf16.gmra.mxu1 %vm1275_vm3, %v2480_v44 }
 0x54d   : > { %v2482_v6 = vpop.permute.xlu1 %2481 }
 0x54e   : > { %3744 = vmatprep.mubr.msk.bf16.mxu1 %vm1275_vm3, %v2482_v6 }
 0x555   : > { %v2484_v17 = vpop.permute.xlu0 %2483 }
 0x556   : > { %3745 = vmatmul.mubr.msk.bf16.gmra.mxu1 %vm1275_vm3, %v2484_v17 }
 0x55d   : > { %v2486_v43 = vpop.permute.xlu1 %2485 }
 0x55e   : > { %3748 = vmatprep.mubr.msk.bf16.mxu1 %vm1275_vm3, %v2486_v43 }
 0x565   : > { %v2488_v59 = vpop.permute.xlu0 %2487 }
 0x566   : > { %3749 = vmatmul.mubr.msk.bf16.gmra.mxu1 %vm1275_vm3, %v2488_v59 }
 0x56d   : > { %v2490_v45 = vpop.permute.xlu1 %2489 }
 0x56e   : > { %3752 = vmatprep.mubr.msk.bf16.mxu1 %vm1275_vm3, %v2490_v45 }
 0x575   : > { %v2492_v42 = vpop.permute.xlu0 %2491 }
 0x576   : > { %3753 = vmatmul.mubr.msk.bf16.gmra.mxu1 %vm1275_vm3, %v2492_v42 }
 0x57d   : > { %v2494_v16 = vpop.permute.xlu1 %2493 }
 0x57e   : > { %3756 = vmatprep.mubr.msk.bf16.mxu1 %vm1275_vm3, %v2494_v16 }
 0x585   : > { %v2496_v62 = vpop.permute.xlu0 %2495 }
 0x586   : > { %3757 = vmatmul.mubr.msk.bf16.gmra.mxu1 %vm1275_vm3, %v2496_v62 }
 0x58d   : > { %v2498_v28 = vpop.permute.xlu1 %2497 }
 0x58e   : > { %3760 = vmatprep.mubr.msk.bf16.mxu1 %vm1275_vm3, %v2498_v28 }
 0x595   : > { %v2500_v24 = vpop.permute.xlu0 %2499 }
 0x596   : > { %3761 = vmatmul.mubr.msk.bf16.gmra.mxu1 %vm1275_vm3, %v2500_v24 }
 0x5e6   : > { %v3734_v48 = vpop.f32.mrf.mxu1 }
 0x5e7   : > { %v2616_v35 = vadd.f32 %v3734_v48, %v4849_v52 }
 0x5e8   : > { %v2607_v51 = vpop.f32.mrf.mxu1 }
 0x5e9   : > { %v2608_v13 = vadd.f32 %v4849_v52, %v2607_v51  ;;  %v2736_v34 = vmax.f32 %v2616_v35, 0.0 }
 0x5ea   : > { %v3735_v3 = vpop.f32.mrf.mxu1 }
 0x5eb   : > { %v2619_v9 = vadd.f32 %v3735_v3, %v4849_v52  ;;  %v2734_v40 = vmax.f32 %v2608_v13, 0.0 }
 0x5ec   : > { %v2610_v12 = vpop.f32.mrf.mxu1 }
 0x5ed   : > { %v2611_v33 = vadd.f32 %v4849_v52, %v2610_v12  ;;  %v2737_v29 = vmax.f32 %v2619_v9, 0.0 }
 0x5ef   : > { %v2735_v50 = vmax.f32 %v2611_v33, 0.0  ;;  %v2767_v57 = vpack.c.bf16 %v2737_v29, %v2736_v34 }
 0x5f1   : > { %v2766_v58 = vpack.c.bf16 %v2735_v50, %v2734_v40 }
 0x5f3   : > { %3772 = vmatprep.mubr.msk.bf16.mxu1 %vm1275_vm3, %v2766_v58 }
 0x5f4   : > { %3773 = vmatmul.mubr.msk.bf16.vlgmr.msra.gmra.mxu1 %vm1275_vm3, %v2767_v57 }
 0x5f6   : > { %v3738_v22 = vpop.f32.mrf.mxu1 }
 0x5f7   : > { %v2632_v38 = vadd.f32 %v3738_v22, %v4849_v52 }
 0x5f8   : > { %v2623_v7 = vpop.f32.mrf.mxu1 }
 0x5f9   : > { %v2624_v60 = vadd.f32 %v4849_v52, %v2623_v7  ;;  %v2740_v11 = vmax.f32 %v2632_v38, 0.0 }
 0x5fa   : > { %v3739_v61 = vpop.f32.mrf.mxu1 }
 0x5fb   : > { %v2635_v49 = vadd.f32 %v3739_v61, %v4849_v52  ;;  %v2738_v19 = vmax.f32 %v2624_v60, 0.0 }
 0x5fc   : > { %v2626_v27 = vpop.f32.mrf.mxu1 }
 0x5fd   : > { %v2627_v56 = vadd.f32 %v4849_v52, %v2626_v27  ;;  %v2741_v0 = vmax.f32 %v2635_v49, 0.0 }
 0x5ff   : > { %v2739_v31 = vmax.f32 %v2627_v56, 0.0  ;;  %v2769_v2 = vpack.c.bf16 %v2741_v0, %v2740_v11 }
 0x601   : > { %v2768_v39 = vpack.c.bf16 %v2739_v31, %v2738_v19 }
 0x603   : > { %3776 = vmatprep.mubr.msk.bf16.mxu1 %vm1275_vm3, %v2768_v39 }
 0x604   : > { %3777 = vmatmul.mubr.msk.bf16.gmra.mxu1 %vm1275_vm3, %v2769_v2 }
 0x606   : > { %v3742_v15 = vpop.f32.mrf.mxu1 }
 0x607   : > { %v2648_v6 = vadd.f32 %v3742_v15, %v4849_v52 }
 0x608   : > { %v2639_v63 = vpop.f32.mrf.mxu1 }
 0x609   : > { %v2640_v1 = vadd.f32 %v4849_v52, %v2639_v63  ;;  %v2744_v45 = vmax.f32 %v2648_v6, 0.0 }
 0x60a   : > { %v3743_v46 = vpop.f32.mrf.mxu1 }
 0x60b   : > { %v2651_v44 = vadd.f32 %v3743_v46, %v4849_v52  ;;  %v2742_v30 = vmax.f32 %v2640_v1, 0.0 }
 0x60c   : > { %v2642_v17 = vpop.f32.mrf.mxu1 }
 0x60d   : > { %v2643_v43 = vadd.f32 %v4849_v52, %v2642_v17  ;;  %v2745_v59 = vmax.f32 %v2651_v44, 0.0 }
 0x60f   : > { %v2743_v23 = vmax.f32 %v2643_v43, 0.0  ;;  %v2771_v42 = vpack.c.bf16 %v2745_v59, %v2744_v45 }
 0x611   : > { %v2770_v37 = vpack.c.bf16 %v2743_v23, %v2742_v30 }
 0x613   : > { %3780 = vmatprep.mubr.msk.bf16.mxu1 %vm1275_vm3, %v2770_v37 }
 0x614   : > { %3781 = vmatmul.mubr.msk.bf16.gmra.mxu1 %vm1275_vm3, %v2771_v42 }
 0x616   : > { %v3746_v16 = vpop.f32.mrf.mxu1 }
 0x617   : > { %v2664_v51 = vadd.f32 %v3746_v16, %v4849_v52 }
 0x618   : > { %v2655_v62 = vpop.f32.mrf.mxu1 }
 0x619   : > { %v2656_v24 = vadd.f32 %v4849_v52, %v2655_v62  ;;  %v2748_v33 = vmax.f32 %v2664_v51, 0.0 }
 0x61a   : > { %v3747_v28 = vpop.f32.mrf.mxu1 }
 0x61b   : > { %v2667_v48 = vadd.f32 %v3747_v28, %v4849_v52  ;;  %v2746_v35 = vmax.f32 %v2656_v24, 0.0 }
 0x61c   : > { %v2658_v3 = vpop.f32.mrf.mxu1 }
 0x61d   : > { %v2659_v13 = vadd.f32 %v4849_v52, %v2658_v3  ;;  %v2749_v9 = vmax.f32 %v2667_v48, 0.0 }
 0x61f   : > { %v2747_v12 = vmax.f32 %v2659_v13, 0.0  ;;  %v2773_v40 = vpack.c.bf16 %v2749_v9, %v2748_v33 }
 0x621   : > { %v2772_v29 = vpack.c.bf16 %v2747_v12, %v2746_v35 }
 0x623   : > { %3784 = vmatprep.mubr.msk.bf16.mxu1 %vm1275_vm3, %v2772_v29 }
 0x624   : > { %3785 = vmatmul.mubr.msk.bf16.gmra.mxu1 %vm1275_vm3, %v2773_v40 }
 0x626   : > { %v3750_v50 = vpop.f32.mrf.mxu1 }
 0x627   : > { %v2680_v7 = vadd.f32 %v3750_v50, %v4849_v52 }
 0x628   : > { %v2671_v34 = vpop.f32.mrf.mxu1 }
 0x629   : > { %v2672_v57 = vadd.f32 %v4849_v52, %v2671_v34  ;;  %v2752_v56 = vmax.f32 %v2680_v7, 0.0 }
 0x62a   : > { %v3751_v58 = vpop.f32.mrf.mxu1 }
 0x62b   : > { %v2683_v22 = vadd.f32 %v3751_v58, %v4849_v52  ;;  %v2750_v38 = vmax.f32 %v2672_v57, 0.0 }
 0x62c   : > { %v2674_v61 = vpop.f32.mrf.mxu1 }
 0x62d   : > { %v2675_v60 = vadd.f32 %v4849_v52, %v2674_v61  ;;  %v2753_v49 = vmax.f32 %v2683_v22, 0.0 }
 0x62f   : > { %v2751_v27 = vmax.f32 %v2675_v60, 0.0  ;;  %v2775_v19 = vpack.c.bf16 %v2753_v49, %v2752_v56 }
 0x631   : > { %v2774_v0 = vpack.c.bf16 %v2751_v27, %v2750_v38  ;;  %v2784_v27 = vadd.f32 %v4630_v25, %v4338_v14 }
 0x633   : > { %3788 = vmatprep.mubr.msk.bf16.mxu1 %vm1275_vm3, %v2774_v0  ;;  %v2782_v0 = vadd.f32 %v4624_v20, %v4318_v8 }
 0x634   : > { %3789 = vmatmul.mubr.msk.bf16.gmra.mxu1 %vm1275_vm3, %v2775_v19 }
 0x636   : > { %v3754_v31 = vpop.f32.mrf.mxu1 }
 0x637   : > { %v2696_v63 = vadd.f32 %v3754_v31, %v4849_v52 }
 0x638   : > { %v2687_v11 = vpop.f32.mrf.mxu1 }
 0x639   : > { %v2688_v2 = vadd.f32 %v4849_v52, %v2687_v11  ;;  %v2756_v43 = vmax.f32 %v2696_v63, 0.0  ;;  %v2785_v11 = vadd.f32 %v4637_v55, %v4342_v21 }
 0x63a   : > { %v3755_v39 = vpop.f32.mrf.mxu1 }
 0x63b   : > { %v2699_v15 = vadd.f32 %v3755_v39, %v4849_v52  ;;  %v2754_v6 = vmax.f32 %v2688_v2, 0.0 }
 0x63c   : > { %v2690_v46 = vpop.f32.mrf.mxu1 }
 0x63d   : > { %v2691_v1 = vadd.f32 %v4849_v52, %v2690_v46  ;;  %v2757_v44 = vmax.f32 %v2699_v15, 0.0  ;;  %v2783_v15 = vadd.f32 %v4627_v5, %v4327_v18  ;;  %v2788_v18 = vadd.f32 %v4646_v10, %v4367_v36 }
 0x63f   : > { %v2755_v17 = vmax.f32 %v2691_v1, 0.0  ;;  %v2777_v30 = vpack.c.bf16 %v2757_v44, %v2756_v43 }
 0x641   : > { %v2776_v59 = vpack.c.bf16 %v2755_v17, %v2754_v6 }
 0x643   : > { %3792 = vmatprep.mubr.msk.bf16.mxu1 %vm1275_vm3, %v2776_v59  ;;  %v2786_v59 = vadd.f32 %v4640_v47, %v4351_v26 }
 0x644   : > { %3793 = vmatmul.mubr.msk.bf16.gmra.mxu1 %vm1275_vm3, %v2777_v30 }
 0x646   : > { %v3758_v23 = vpop.f32.mrf.mxu1 }
 0x647   : > { %v2712_v62 = vadd.f32 %v3758_v23, %v4849_v52 }
 0x648   : > { %v2703_v45 = vpop.f32.mrf.mxu1 }
 0x649   : > { %v2704_v42 = vadd.f32 %v4849_v52, %v2703_v45  ;;  %v2760_v13 = vmax.f32 %v2712_v62, 0.0  ;;  %v2789_v45 = vadd.f32 %v4649_v53, %v4371_v41 }
 0x64a   : > { %v3759_v37 = vpop.f32.mrf.mxu1 }
 0x64b   : > { %v2715_v16 = vadd.f32 %v3759_v37, %v4849_v52  ;;  %v2758_v51 = vmax.f32 %v2704_v42, 0.0 }
 0x64c   : > { %v2706_v28 = vpop.f32.mrf.mxu1 }
 0x64d   : > { %v2707_v24 = vadd.f32 %v4849_v52, %v2706_v28  ;;  %v2761_v48 = vmax.f32 %v2715_v16, 0.0  ;;  %v2787_v16 = vadd.f32 %v4643_v4, %v4358_v32  ;;  %v4936_v32 = vld [vmem:[%s542_s23] sm:$0xff]  ;;  %s3909_s23 = scalar_lea.vmem %s5047_s29, 128 }
 0x64e   : > { %v3486_v4 = vcombine.high %v4936_v32, %v4936_v32  ;;  %p3910_p12 = scmp.ne.s32.totalorder %s5047_s29, %s3909_s23  ;;  %p3917_p2 = scmp.lt.s32.totalorder %s3915_s26, %s3909_s23 }
 0x64f   : > { %v2759_v3 = vmax.f32 %v2707_v24, 0.0  ;;  %v2779_v35 = vpack.c.bf16 %v2761_v48, %v2760_v13 }
 0x650   : > { %3214 = vmatprep.mubr.bf16.mxu0 %v3486_v4  ;;  %p3911_p13 = pnand %p3910_p12, %p4097_p5  ;;  %p3918_p3 = por %p3917_p2, %p3916_p1 }
 0x651   : > { %v2778_v9 = vpack.c.bf16 %v2759_v3, %v2758_v51 }
 0x652   : > { %p3912_p0 = pneg %p3911_p13 }
 0x653   : > { %3796 = vmatprep.mubr.msk.bf16.mxu1 %vm1275_vm3, %v2778_v9  ;;  %v5167_v9 = vld [vmem:[#allocation33_spill] sm:$0xff] }
 0x654   : > { %3797 = vmatmul.mubr.msk.bf16.gmra.mxu1 %vm1275_vm3, %v2779_v35  ;;  %v2792_v35 = vadd.f32 %v5167_v9, %v4393_v54  ;;  %p3919_p4 = pnand %p3918_p3, %p3912_p0 }
 0x656   : > { %v3762_v12 = vpop.f32.mrf.mxu1 }
 0x657   : > { %v2728_v34 = vadd.f32 %v3762_v12, %v4849_v52 }
 0x658   : > { %v2719_v33 = vpop.f32.mrf.mxu1 }
 0x659   : > { %v2720_v40 = vadd.f32 %v4849_v52, %v2719_v33  ;;  %v2764_v60 = vmax.f32 %v2728_v34, 0.0  ;;  %v5168_v33 = vld [vmem:[#allocation8_spill] sm:$0xff] }
 0x65a   : > { %v3763_v29 = vpop.f32.mrf.mxu1 }
 0x65b   : > { %v2731_v50 = vadd.f32 %v3763_v29, %v4849_v52  ;;  %v2762_v7 = vmax.f32 %v2720_v40, 0.0  ;;  %v5169_v29 = vld [vmem:[#allocation31_spill] sm:$0xff] }
 0x65c   : > { %v2722_v58 = vpop.f32.mrf.mxu1  ;;  %v2790_v40 = vadd.f32 %v5169_v29, %v5168_v33 }
 0x65d   : > { %v2723_v57 = vadd.f32 %v4849_v52, %v2722_v58  ;;  %v2765_v22 = vmax.f32 %v2731_v50, 0.0  ;;  %v4906_v52 = vld [vmem:[%s5101_s15] ss:$0 sm:$0xff] }
 0x65e   : > { %v5170_v58 = vld [vmem:[#allocation10_spill] sm:$0xff] }
 0x65f   : > { %v2763_v61 = vmax.f32 %v2723_v57, 0.0  ;;  %v2781_v38 = vpack.c.bf16 %v2765_v22, %v2764_v60  ;;  %v5171_v57 = vld [vmem:[#allocation34_spill] sm:$0xff]  ;;  %v5172_v60 = vld [vmem:[#allocation9_spill] sm:$0xff] }
 0x660   : > { %v2793_v22 = vadd.f32 %v5171_v57, %v5170_v58 }
 0x661   : > { %v2780_v49 = vpack.c.bf16 %v2763_v61, %v2762_v7 }
 0x663   : > { %3800 = vmatprep.mubr.msk.bf16.mxu1 %vm1275_vm3, %v2780_v49  ;;  %v5173_v49 = vld [vmem:[#allocation32_spill] sm:$0xff] }
 0x664   : > { %3801 = vmatmul.mubr.msk.bf16.gmra.mxu1 %vm1275_vm3, %v2781_v38  ;;  %v2791_v38 = vadd.f32 %v5173_v49, %v5172_v60 }
 0x6b4   : > { %v3774_v56 = vpop.f32.mrf.mxu1 }
 0x6b5   : > { %v3057_v19 = vadd.f32 %v3774_v56, %v2784_v27 }
 0x6b6   : > { %v2928_v31 = vpop.f32.mrf.mxu1 }
 0x6b7   : > { %v3055_v39 = vadd.f32 %v2928_v31, %v2782_v0  ;;  %v3096_v14 = vadd.f32 %v4906_v52, %v3057_v19 }
 0x6b8   : > { %v3775_v2 = vpop.f32.mrf.mxu1 }
 0x6b9   : > { %v3058_v25 = vadd.f32 %v3775_v2, %v2785_v11  ;;  %v3094_v8 = vadd.f32 %v4906_v52, %v3055_v39  ;;  %v3128_v1 = vmax.f32 %v3096_v14, 0.0 }
 0x6ba   : > { %v2931_v63 = vpop.f32.mrf.mxu1 }
 0x6bb   : > { %v3097_v20 = vadd.f32 %v4906_v52, %v3058_v25  ;;  %v3056_v46 = vadd.f32 %v2931_v63, %v2783_v15  ;;  %v3126_v21 = vmax.f32 %v3094_v8, 0.0  ;;  %v5174_v8 = vld [vmem:[#allocation13_spill] sm:$0xff] }
 0x6bd   : > { %v3129_v44 = vmax.f32 %v3097_v20, 0.0  ;;  %v3095_v6 = vadd.f32 %v4906_v52, %v3056_v46  ;;  %v5175_v20 = vld [vmem:[#allocation37_spill] sm:$0xff] }
 0x6be   : > { %v2796_v46 = vadd.f32 %v5175_v20, %v5174_v8 }
 0x6bf   : > { %v4916_v55 = vpack.c.bf16 %v3129_v44, %v3128_v1  ;;  %v3127_v17 = vmax.f32 %v3095_v6, 0.0  ;;  %v5176_v44 = vld [vmem:[#allocation11_spill] sm:$0xff] }
 0x6c0   : > { %v5177_v6 = vld [vmem:[#allocation35_spill] sm:$0xff] }
 0x6c1   : > { %v4918_v43 = vpack.c.bf16 %v3127_v17, %v3126_v21  ;;  %v2794_v21 = vadd.f32 %v5177_v6, %v5176_v44  ;;  %v5190_v44 = vld [vmem:[#allocation21_spill] sm:$0xff] }
 0x6c2   : > { %v5191_v6 = vld [vmem:[#allocation45_spill] sm:$0xff] }
 0x6c4   : > { %v3778_v5 = vpop.f32.mrf.mxu1 }
 0x6c5   : > { %v3061_v30 = vadd.f32 %v3778_v5, %v2788_v18  ;;  %v5178_v5 = vld [vmem:[#allocation14_spill] sm:$0xff] }
 0x6c6   : > { %v2944_v23 = vpop.f32.mrf.mxu1 }
 0x6c7   : > { %v3059_v37 = vadd.f32 %v2944_v23, %v2786_v59  ;;  %v3100_v62 = vadd.f32 %v4906_v52, %v3061_v30  ;;  %v5179_v59 = vld [vmem:[#allocation38_spill] sm:$0xff] }
 0x6c8   : > { %v3779_v42 = vpop.f32.mrf.mxu1  ;;  %v2797_v30 = vadd.f32 %v5179_v59, %v5178_v5  ;;  %v5193_v5 = vld [vmem:[#allocation43_spill] sm:$0xff] }
 0x6c9   : > { %v3062_v28 = vadd.f32 %v3779_v42, %v2789_v45  ;;  %v3098_v10 = vadd.f32 %v4906_v52, %v3059_v37  ;;  %v3132_v41 = vmax.f32 %v3100_v62, 0.0  ;;  %v5180_v37 = vld [vmem:[#allocation12_spill] sm:$0xff] }
 0x6ca   : > { %v2947_v36 = vpop.f32.mrf.mxu1  ;;  %v5181_v42 = vld [vmem:[#allocation36_spill] sm:$0xff] }
 0x6cb   : > { %v3101_v26 = vadd.f32 %v4906_v52, %v3062_v28  ;;  %v3060_v47 = vadd.f32 %v2947_v36, %v2787_v16  ;;  %v3130_v48 = vmax.f32 %v3098_v10, 0.0  ;;  %v2795_v16 = vadd.f32 %v5181_v42, %v5180_v37  ;;  %v5195_v37 = vld [vmem:[#allocation46_spill] sm:$0xff] }
 0x6cd   : > { %v3133_v53 = vmax.f32 %v3101_v26, 0.0  ;;  %v3099_v24 = vadd.f32 %v4906_v52, %v3060_v47 }
 0x6cf   : > { %v4940_v51 = vpack.c.bf16 %v3133_v53, %v3132_v41  ;;  %v3131_v3 = vmax.f32 %v3099_v24, 0.0 }
 0x6d1   : > { %v4942_v13 = vpack.c.bf16 %v3131_v3, %v3130_v48 }
 0x6d4   : > { %v3782_v12 = vpop.f32.mrf.mxu1 }
 0x6d5   : > { %v3065_v50 = vadd.f32 %v3782_v12, %v2792_v35  ;;  %v5182_v35 = vld [vmem:[#allocation17_spill] sm:$0xff] }
 0x6d6   : > { %v2960_v34 = vpop.f32.mrf.mxu1  ;;  %v5183_v12 = vld [vmem:[#allocation41_spill] sm:$0xff] }
 0x6d7   : > { %v3063_v7 = vadd.f32 %v2960_v34, %v2790_v40  ;;  %v3104_v27 = vadd.f32 %v4906_v52, %v3065_v50  ;;  %v2800_v33 = vadd.f32 %v5183_v12, %v5182_v35  ;;  %v5184_v40 = vld [vmem:[#allocation15_spill] sm:$0xff] }
 0x6d8   : > { %v3783_v61 = vpop.f32.mrf.mxu1  ;;  %v5185_v50 = vld [vmem:[#allocation39_spill] sm:$0xff] }
 0x6d9   : > { %v3066_v56 = vadd.f32 %v3783_v61, %v2793_v22  ;;  %v3102_v54 = vadd.f32 %v4906_v52, %v3063_v7  ;;  %v3136_v11 = vmax.f32 %v3104_v27, 0.0  ;;  %v2798_v34 = vadd.f32 %v5185_v50, %v5184_v40  ;;  %v5186_v22 = vld [vmem:[#allocation18_spill] sm:$0xff]  ;;  %v5189_v27 = vld [vmem:[#allocation40_spill] sm:$0xff] }
 0x6da   : > { %v2963_v0 = vpop.f32.mrf.mxu1  ;;  %v5187_v7 = vld [vmem:[#allocation42_spill] sm:$0xff] }
 0x6db   : > { %v3105_v19 = vadd.f32 %v4906_v52, %v3066_v56  ;;  %v3064_v31 = vadd.f32 %v2963_v0, %v2791_v38  ;;  %v3134_v15 = vmax.f32 %v3102_v54, 0.0  ;;  %v2801_v61 = vadd.f32 %v5187_v7, %v5186_v22  ;;  %v5188_v38 = vld [vmem:[#allocation16_spill] sm:$0xff]  ;;  %v5200_v7 = vld [vmem:[#allocation23_spill] sm:$0xff] }
 0x6dc   : > { %v2799_v56 = vadd.f32 %v5189_v27, %v5188_v38  ;;  %v5202_v27 = vld [vmem:[#allocation26_spill] sm:$0xff] }
 0x6dd   : > { %v3137_v39 = vmax.f32 %v3105_v19, 0.0  ;;  %v3103_v2 = vadd.f32 %v4906_v52, %v3064_v31 }
 0x6df   : > { %v4956_v14 = vpack.c.bf16 %v3137_v39, %v3136_v11  ;;  %v3135_v25 = vmax.f32 %v3103_v2, 0.0 }
 0x6e1   : > { %v4958_v63 = vpack.c.bf16 %v3135_v25, %v3134_v15 }
 0x6e4   : > { %v3786_v1 = vpop.f32.mrf.mxu1 }
 0x6e5   : > { %v3069_v17 = vadd.f32 %v3786_v1, %v2796_v46 }
 0x6e6   : > { %v2976_v18 = vpop.f32.mrf.mxu1 }
 0x6e7   : > { %v3067_v23 = vadd.f32 %v2976_v18, %v2794_v21  ;;  %v3108_v62 = vadd.f32 %v4906_v52, %v3069_v17  ;;  %v2804_v21 = vadd.f32 %v5191_v6, %v5190_v44  ;;  %v5192_v18 = vld [vmem:[#allocation19_spill] sm:$0xff] }
 0x6e8   : > { %v3787_v45 = vpop.f32.mrf.mxu1  ;;  %v2802_v59 = vadd.f32 %v5193_v5, %v5192_v18 }
 0x6e9   : > { %v3070_v28 = vadd.f32 %v3787_v45, %v2797_v30  ;;  %v3106_v10 = vadd.f32 %v4906_v52, %v3067_v23  ;;  %v3140_v41 = vmax.f32 %v3108_v62, 0.0  ;;  %v5194_v45 = vld [vmem:[#allocation22_spill] sm:$0xff] }
 0x6ea   : > { %v2979_v36 = vpop.f32.mrf.mxu1  ;;  %v2805_v42 = vadd.f32 %v5195_v37, %v5194_v45  ;;  %v5207_v45 = vld [vmem:[#allocation53_spill] sm:$0xff] }
 0x6eb   : > { %v3109_v26 = vadd.f32 %v4906_v52, %v3070_v28  ;;  %v3068_v47 = vadd.f32 %v2979_v36, %v2795_v16  ;;  %v3138_v4 = vmax.f32 %v3106_v10, 0.0  ;;  %v5196_v28 = vld [vmem:[#allocation20_spill] sm:$0xff] }
 0x6ec   : > { %v5197_v36 = vld [vmem:[#allocation44_spill] sm:$0xff] }
 0x6ed   : > { %v3141_v53 = vmax.f32 %v3109_v26, 0.0  ;;  %v3107_v24 = vadd.f32 %v4906_v52, %v3068_v47  ;;  %v2803_v10 = vadd.f32 %v5197_v36, %v5196_v28 }
 0x6ef   : > { %v4972_v48 = vpack.c.bf16 %v3141_v53, %v3140_v41  ;;  %v3139_v3 = vmax.f32 %v3107_v24, 0.0 }
 0x6f1   : > { %v4974_v9 = vpack.c.bf16 %v3139_v3, %v3138_v4 }
 0x6f4   : > { %v3790_v29 = vpop.f32.mrf.mxu1 }
 0x6f5   : > { %v3073_v58 = vadd.f32 %v3790_v29, %v2800_v33 }
 0x6f6   : > { %v2992_v57 = vpop.f32.mrf.mxu1 }
 0x6f7   : > { %v3071_v60 = vadd.f32 %v2992_v57, %v2798_v34  ;;  %v3112_v0 = vadd.f32 %v4906_v52, %v3073_v58  ;;  %v5198_v34 = vld [vmem:[#allocation25_spill] sm:$0xff] }
 0x6f8   : > { %v3791_v49 = vpop.f32.mrf.mxu1  ;;  %v5199_v58 = vld [vmem:[#allocation49_spill] sm:$0xff] }
 0x6f9   : > { %v3074_v54 = vadd.f32 %v3791_v49, %v2801_v61  ;;  %v3110_v31 = vadd.f32 %v4906_v52, %v3071_v60  ;;  %v3144_v2 = vmax.f32 %v3112_v0, 0.0  ;;  %v2808_v57 = vadd.f32 %v5199_v58, %v5198_v34  ;;  %v5201_v61 = vld [vmem:[#allocation47_spill] sm:$0xff] }
 0x6fa   : > { %v2995_v19 = vpop.f32.mrf.mxu1  ;;  %v2806_v60 = vadd.f32 %v5201_v61, %v5200_v7 }
 0x6fb   : > { %v3113_v11 = vadd.f32 %v4906_v52, %v3074_v54  ;;  %v3072_v39 = vadd.f32 %v2995_v19, %v2799_v56  ;;  %v3142_v8 = vmax.f32 %v3110_v31, 0.0  ;;  %v5203_v56 = vld [vmem:[#allocation50_spill] sm:$0xff]  ;;  %v5204_v31 = vld [vmem:[#allocation24_spill] sm:$0xff] }
 0x6fc   : > { %v2809_v0 = vadd.f32 %v5203_v56, %v5202_v27 }
 0x6fd   : > { %v3145_v15 = vmax.f32 %v3113_v11, 0.0  ;;  %v3111_v25 = vadd.f32 %v4906_v52, %v3072_v39  ;;  %v5205_v11 = vld [vmem:[#allocation48_spill] sm:$0xff] }
 0x6fe   : > { %v2807_v39 = vadd.f32 %v5205_v11, %v5204_v31 }
 0x6ff   : > { %v3143_v20 = vmax.f32 %v3111_v25, 0.0  ;;  %v4988_v46 = vpack.c.bf16 %v3145_v15, %v3144_v2 }
 0x701   : > { %v4990_v1 = vpack.c.bf16 %v3143_v20, %v3142_v8 }
 0x704   : > { %v3794_v17 = vpop.f32.mrf.mxu1 }
 0x705   : > { %v3077_v30 = vadd.f32 %v3794_v17, %v2804_v21 }
 0x706   : > { %v3008_v23 = vpop.f32.mrf.mxu1 }
 0x707   : > { %v3075_v16 = vadd.f32 %v3008_v23, %v2802_v59  ;;  %v3116_v26 = vadd.f32 %v4906_v52, %v3077_v30  ;;  %v5206_v23 = vld [vmem:[#allocation29_spill] sm:$0xff] }
 0x708   : > { %v3795_v62 = vpop.f32.mrf.mxu1  ;;  %v2812_v37 = vadd.f32 %v5207_v45, %v5206_v23 }
 0x709   : > { %v3078_v47 = vadd.f32 %v3795_v62, %v2805_v42  ;;  %v3114_v53 = vadd.f32 %v4906_v52, %v3075_v16  ;;  %v3148_v3 = vmax.f32 %v3116_v26, 0.0  ;;  %v5208_v16 = vld [vmem:[#allocation27_spill] sm:$0xff]  ;;  %v5210_v26 = vld [vmem:[#allocation30_spill] sm:$0xff] }
 0x70a   : > { %v3011_v41 = vpop.f32.mrf.mxu1  ;;  %v5209_v62 = vld [vmem:[#allocation51_spill] sm:$0xff] }
 0x70b   : > { %v3117_v24 = vadd.f32 %v4906_v52, %v3078_v47  ;;  %v3076_v4 = vadd.f32 %v3011_v41, %v2803_v10  ;;  %v3146_v33 = vmax.f32 %v3114_v53, 0.0  ;;  %v2810_v28 = vadd.f32 %v5209_v62, %v5208_v16  ;;  %v5211_v47 = vld [vmem:[#allocation54_spill] sm:$0xff] }
 0x70c   : > { %v2813_v41 = vadd.f32 %v5211_v47, %v5210_v26 }
 0x70d   : > { %v3149_v35 = vmax.f32 %v3117_v24, 0.0  ;;  %v3115_v12 = vadd.f32 %v4906_v52, %v3076_v4  ;;  %v5212_v4 = vld [vmem:[#allocation28_spill] sm:$0xff] }
 0x70f   : > { %v3147_v29 = vmax.f32 %v3115_v12, 0.0  ;;  %v3170_v40 = vpack.c.bf16 %v3149_v35, %v3148_v3  ;;  %v5213_v3 = vld [vmem:[#allocation52_spill] sm:$0xff] }
 0x710   : > { %v2811_v35 = vadd.f32 %v5213_v3, %v5212_v4 }
 0x711   : > { %v3169_v50 = vpack.c.bf16 %v3147_v29, %v3146_v33 }
 0x714   : > { %v3798_v22 = vpop.f32.mrf.mxu1 }
 0x715   : > { %v3081_v49 = vadd.f32 %v3798_v22, %v2808_v57 }
 0x716   : > { %v3024_v38 = vpop.f32.mrf.mxu1 }
 0x717   : > { %v3079_v54 = vadd.f32 %v3024_v38, %v2806_v60  ;;  %v3120_v2 = vadd.f32 %v4906_v52, %v3081_v49 }
 0x718   : > { %v3799_v19 = vpop.f32.mrf.mxu1 }
 0x719   : > { %v3082_v15 = vadd.f32 %v3799_v19, %v2809_v0  ;;  %v3118_v8 = vadd.f32 %v4906_v52, %v3079_v54  ;;  %v3152_v6 = vmax.f32 %v3120_v2, 0.0 }
 0x71a   : > { %v3027_v25 = vpop.f32.mrf.mxu1 }
 0x71b   : > { %v3121_v20 = vadd.f32 %v4906_v52, %v3082_v15  ;;  %v3080_v44 = vadd.f32 %v3027_v25, %v2807_v39  ;;  %v3150_v18 = vmax.f32 %v3118_v8, 0.0 }
 0x71d   : > { %v3153_v21 = vmax.f32 %v3121_v20, 0.0  ;;  %v3119_v17 = vadd.f32 %v4906_v52, %v3080_v44 }
 0x71f   : > { %v3151_v5 = vmax.f32 %v3119_v17, 0.0  ;;  %v3172_v59 = vpack.c.bf16 %v3153_v21, %v3152_v6 }
 0x721   : > { %v3171_v30 = vpack.c.bf16 %v3151_v5, %v3150_v18 }
 0x724   : > { %v3802_v42 = vpop.f32.mrf.mxu1 }
 0x725   : > { %v3085_v36 = vadd.f32 %v3802_v42, %v2812_v37 }
 0x726   : > { %v3040_v10 = vpop.f32.mrf.mxu1 }
 0x727   : > { %v3083_v53 = vadd.f32 %v3040_v10, %v2810_v28  ;;  %v3124_v12 = vadd.f32 %v4906_v52, %v3085_v36 }
 0x728   : > { %v3803_v24 = vpop.f32.mrf.mxu1 }
 0x729   : > { %v3086_v33 = vadd.f32 %v3803_v24, %v2813_v41  ;;  %v3122_v34 = vadd.f32 %v4906_v52, %v3083_v53  ;;  %v3156_v22 = vmax.f32 %v3124_v12, 0.0 }
 0x72a   : > { %v3043_v29 = vpop.f32.mrf.mxu1 }
 0x72b   : > { %v3125_v58 = vadd.f32 %v4906_v52, %v3086_v33  ;;  %v3084_v57 = vadd.f32 %v3043_v29, %v2811_v35  ;;  %v3154_v60 = vmax.f32 %v3122_v34, 0.0 }
 0x72d   : > { %v3157_v7 = vmax.f32 %v3125_v58, 0.0  ;;  %v3123_v61 = vadd.f32 %v4906_v52, %v3084_v57  ;;  %v3485_v52 = vcombine.low %v4936_v32, %v4936_v32 }
 0x72f   : > { %v3155_v49 = vmax.f32 %v3123_v61, 0.0  ;;  %v3174_v38 = vpack.c.bf16 %v3157_v7, %v3156_v22 }
 0x731   : > { %3588 = vmatprep.subr.bf16.mxu0 %v3174_v38  ;;  %v3173_v27 = vpack.c.bf16 %v3155_v49, %v3154_v60 }
 0x732   : > { %3589 = vmatpush3.bf16.msra.mxu0 %v4972_v48 }
 0x733   : > { %3590 = vmatprep.subr.bf16.mxu0 %v3173_v27 }
 0x736   : > { %3591 = vmatpush3.bf16.msra.mxu0 %v4974_v9 }
 0x737   : > { %3592 = vmatprep.subr.bf16.mxu0 %v3172_v59 }
 0x73a   : > { %3593 = vmatpush3.bf16.msra.mxu0 %v4956_v14 }
 0x73b   : > { %3594 = vmatprep.subr.bf16.mxu0 %v3171_v30 }
 0x73e   : > { %3595 = vmatpush3.bf16.msra.mxu0 %v4958_v63 }
 0x73f   : > { %3596 = vmatprep.subr.bf16.mxu0 %v3170_v40 }
 0x742   : > { %3597 = vmatpush3.bf16.msra.mxu0 %v4940_v51 }
 0x743   : > { %3598 = vmatprep.subr.bf16.mxu0 %v3169_v50 }
 0x746   : > { %3599 = vmatpush3.bf16.msra.mxu0 %v4942_v13 }
 0x747   : > { %3600 = vmatprep.subr.bf16.mxu0 %v4988_v46 }
 0x74a   : > { %3601 = vmatpush3.bf16.msra.mxu0 %v4916_v55 }
 0x74b   : > { %3602 = vmatprep.subr.bf16.mxu0 %v4990_v1 }
 0x74e   : > { %3603 = vmatpush3.bf16.msra.mxu0 %v4918_v43 }
 0x751   : > { %3215 = vmatmul.mubr.bf16.vlgmr.msra.gmra.mxu0 %v3485_v52 }
 0x811   : > { %v3604_v14 = vpop.f32.mrf.mxu0 }
 0x813   : > { %v3605_v51 = vpop.f32.mrf.mxu0 }
 0x814   : > { %v3606_v13 = vadd.f32 %v3605_v51, %v3604_v14 }
 0x815   : > { %v3607_v55 = vpop.f32.mrf.mxu0 }
 0x816   : > { %3222 = vst [vmem:[%s531_s2] sm:$0xff] %v3606_v13 }
 0x817   : > { %v3608_v43 = vpop.f32.mrf.mxu0 }
 0x818   : > { %3922 = shalt.err (!%p3919_p4)
}
 0x819   : > { %s3923_s28 = scalar_lea.hbm %s5045_s19, 128  ;;  %s3927_s18 = scalar_lea.hbm %s5102_s16, 256 }
 0x81a   : > { %p3924_p7 = scmp.ne.s32.totalorder %s5045_s19, %s3923_s28  ;;  %p3928_p10 = scmp.lt.s32.totalorder %s5045_s19, %s5102_s16 }
 0x81b   : > { %p3929_p11 = scmp.lt.s32.totalorder %s3927_s18, %s3923_s28 }
 0x81c   : > { %p3925_p8 = pnand %p3924_p7, %p4097_p5 }
 0x81d   : > { %p3930_p12 = por %p3929_p11, %p3928_p10 }
 0x81e   : > { %p3926_p9 = pneg %p3925_p8 }
 0x820   : > { %p3931_p13 = pnand %p3930_p12, %p3926_p9 }
 0x822   : > { %3934 = shalt.err (!%p3931_p13)
}
 0x823   : > { %3809 = dma.vmem_to_hbm [thread:$0]  (%p4097_p5), %s5047_s29, 128, %s5045_s19, %s3224_s20  }
 0x824 PF: > { %p3815_p0 = scmp.ge.s32.totalorder %s3969_s24, 2  ;;  %s3249_s23 = sand.u32 1, %s3957_s21  }
 0x825   : > { %s3250_s1 = scalar_lea.sflag [#allocation3], %s3249_s23 }
 0x826   : > { %p3812_p1 = pnand %p3815_p0, %p4101_p6 }
 0x828   : > { %p3813_p2 = pneg %p3812_p1 }
 0x82a   : > { %3952 = dma.done.wait (%p3813_p2), %s3250_s1, 128  }
 0x82b   : > { %3954 = vsyncadd (%p3813_p2), %s3250_s1, 4294967168  ;;  %s5214_s24 = sld [smem:[#allocation6_spill]]  ;;  %s5217_s21 = smov %s3961_s22 }
 0x82c   : > { %s5215_s30 = sld [smem:[#allocation5_spill]] }
 0x82d   : > { %s5216_s23 = sld [smem:[#allocation7_spill]] }
 0x831   : > { %p26_p3 = scmp.ge.s32.totalorder %s5214_s24, 4  }
 0x832   : > { %s5218_s22 = smov %s5215_s30 }
 0x833   :  { %28 = sbr.rel (!%p26_p3) target bundleno = 7 (0x7), region = 122 }
 0x838   :  { %3255 = vsyncpa [#allocation3], 1 }
 0x839   :  { %3257 = vsyncpa [#allocation3 + $0x1], 1 }

</bundles_post_ra>
